<compile_context>
chip_gen: v7x
topology: tpu7x:2x2x1
jax: 0.10.0
libtpu: 0.0.40
codegen_flags: <defaults>
</compile_context>

<pallas_src>
import jax
import jax.numpy as jnp
from jax.experimental import pallas as pl
from jax.experimental.pallas import tpu as pltpu


def _global_agg_kernel(ev_ref, nv_ref, nw_ref,
                       t_ref, wb_ref, s_ref, g2_ref, r_ref, p_ref, o_ref):
    # ev_ref : (tm, D)       nv_ref : (tm, K*D)     nw_ref : (tm, K)
    # t_ref  : (D, K*D)      wb_ref : (K*D, K*D)    s_ref  : (K, K*D)
    # g2_ref : (K*D, K)      r_ref  : (K, K*D)      p_ref  : (K*D, D)
    f32 = jnp.float32
    HI = jax.lax.Precision.HIGHEST

    ev = ev_ref[...]                                   # (tm, D)
    nv = nv_ref[...]                                   # (tm, K*D) lane-dense
    nw = nw_ref[...]                                   # (tm, K)

    # Replicate ev across the K lane-groups: ev_t[m, k*D+d] = ev[m, d].
    ev_t = jnp.dot(ev, t_ref[...], preferred_element_type=f32, precision=HI)
    prod = ev_t * nv                                   # (tm, K*D), dense VPU

    # cat([prod, nw], -1) @ w_1  ==  prod @ blockdiag(w1[:D]) + nw @ scatter(w1[D])
    h = jnp.dot(prod, wb_ref[...], preferred_element_type=f32, precision=HI)
    h = h + jnp.dot(nw, s_ref[...], preferred_element_type=f32, precision=HI)
    h = jnp.where(h >= 0, h, 0.2 * h)                  # leaky_relu(slope=0.2)

    # Per-(m,k) projection onto w_2: each D-lane group -> one alpha per k.
    alpha = jnp.dot(h, g2_ref[...], preferred_element_type=f32, precision=HI)  # (tm, K)

    # Softmax over K (tiny (tm, K) tensor); exact division for f32 parity.
    mmax = jnp.max(alpha, axis=-1, keepdims=True)
    e = jnp.exp(alpha - mmax)
    denom = jnp.sum(e, axis=-1, keepdims=True)
    a = e / denom

    # Broadcast a over each D-lane group, weight neighbors, reduce over K.
    a_exp = jnp.dot(a, r_ref[...], preferred_element_type=f32, precision=HI)   # (tm, K*D)
    out = jnp.dot(a_exp * nv, p_ref[...], preferred_element_type=f32, precision=HI)  # (tm, D)
    o_ref[...] = out.astype(o_ref.dtype)


def _mean_kernel(nv_ref, p_ref, o_ref):
    # nv_ref : (tm, K*D) packed, p_ref : (K*D, D) = group-sum / K
    o_ref[...] = jnp.dot(nv_ref[...], p_ref[...],
                         preferred_element_type=jnp.float32).astype(o_ref.dtype)


def _tiling(m, cap=2048):
    """Pick tile_m (multiple of 8, <= ~cap) and the padded row count."""
    steps = max(1, -(-m // cap))          # ceil(m / cap)
    tile = -(-m // steps)                 # ceil(m / steps)
    tile = ((tile + 7) // 8) * 8          # sublane alignment
    return tile, tile * steps


def _pad_rows(x, mp):
    m = x.shape[0]
    if mp == m:
        return x
    return jnp.pad(x, ((0, mp - m), (0, 0)))


def global_aggregator_forward(self_vectors, neighbor_vector, batch_size, masks,
                              neighbor_weight, params, extra_vector=None):
    """Matches GlobalAggregator.forward; self_vectors/batch_size/masks are
    unused by the reference forward pass (kept for signature fidelity)."""
    del self_vectors, batch_size, masks
    B, N, K, D = neighbor_vector.shape
    M, KD = B * N, K * D
    f32 = jnp.float32

    tile_m, Mp = _tiling(M)
    grid = (Mp // tile_m,)

    eye_k = jnp.eye(K, dtype=f32)
    eye_d = jnp.eye(D, dtype=f32)
    P = jnp.kron(jnp.ones((K, 1), f32), eye_d)     # (KD, D)   P[kD+d, d'] = [d==d']

    # Lane-dense packing of K*D (free reshape on contiguous HBM arrays).
    nv2 = _pad_rows(neighbor_vector.reshape(M, KD), Mp)

    cparams = pltpu.CompilerParams(
        dimension_semantics=("parallel",),
        vmem_limit_bytes=32 * 1024 * 1024,
    )

    if extra_vector is None:
        out2 = pl.pallas_call(
            _mean_kernel,
            out_shape=jax.ShapeDtypeStruct((Mp, D), neighbor_vector.dtype),
            grid_spec=pltpu.PrefetchScalarGridSpec(
                num_scalar_prefetch=0,
                grid=grid,
                in_specs=[
                    pl.BlockSpec((tile_m, KD), lambda i: (i, 0)),
                    pl.BlockSpec((KD, D), lambda i: (0, 0)),
                ],
                out_specs=pl.BlockSpec((tile_m, D), lambda i: (i, 0)),
            ),
            compiler_params=cparams,
            cost_estimate=pl.CostEstimate(
                flops=2 * Mp * KD * D,
                transcendentals=0,
                bytes_accessed=4 * (Mp * (KD + D) + KD * D),
            ),
        )(nv2, P * (1.0 / K))
        return out2[:M].reshape(B, N, D)

    w1 = params["w_1"].astype(f32)                 # (D+1, D)
    w2 = params["w_2"].astype(f32)                 # (D, 1)
    w1a, w1b = w1[:D, :], w1[D:, :]                # (D, D), (1, D)

    T = jnp.kron(jnp.ones((1, K), f32), eye_d)     # (D, KD)   T[d, kD+d'] = [d==d']
    Wb = jnp.kron(eye_k, w1a)                      # (KD, KD)  block-diag(w1a)
    S = jnp.kron(eye_k, w1b)                       # (K, KD)   S[k, kD+j] = w1b[j]
    G2 = jnp.kron(eye_k, w2)                       # (KD, K)   G2[kD+d, k] = w2[d]
    R = jnp.kron(eye_k, jnp.ones((1, D), f32))     # (K, KD)   R[k, kD+d] = 1

    ev2 = _pad_rows(extra_vector.reshape(M, D), Mp)
    nw2 = _pad_rows(neighbor_weight.reshape(M, K), Mp)

    flops = 2 * Mp * (D * KD + KD * KD + K * KD + KD * K + K * KD + KD * D)
    bytes_accessed = 4 * (Mp * (D + KD + K + D)
                          + D * KD + KD * KD + 2 * K * KD + KD * K + KD * D)

    out2 = pl.pallas_call(
        _global_agg_kernel,
        out_shape=jax.ShapeDtypeStruct((Mp, D), neighbor_vector.dtype),
        grid_spec=pltpu.PrefetchScalarGridSpec(
            num_scalar_prefetch=0,
            grid=grid,
            in_specs=[
                pl.BlockSpec((tile_m, D), lambda i: (i, 0)),    # extra_vector
                pl.BlockSpec((tile_m, KD), lambda i: (i, 0)),   # neighbor_vector (packed)
                pl.BlockSpec((tile_m, K), lambda i: (i, 0)),    # neighbor_weight
                pl.BlockSpec((D, KD), lambda i: (0, 0)),        # T   (loaded once)
                pl.BlockSpec((KD, KD), lambda i: (0, 0)),       # Wb
                pl.BlockSpec((K, KD), lambda i: (0, 0)),        # S
                pl.BlockSpec((KD, K), lambda i: (0, 0)),        # G2
                pl.BlockSpec((K, KD), lambda i: (0, 0)),        # R
                pl.BlockSpec((KD, D), lambda i: (0, 0)),        # P
            ],
            out_specs=pl.BlockSpec((tile_m, D), lambda i: (i, 0)),
        ),
        compiler_params=cparams,
        cost_estimate=pl.CostEstimate(
            flops=flops,
            transcendentals=Mp * K,
            bytes_accessed=bytes_accessed,
        ),
    )(ev2, nv2, nw2, T, Wb, S, G2, R, P)

    return out2[:M].reshape(B, N, D)


def _reference_forward(neighbor_vector, neighbor_weight, extra_vector, w1, w2):
    """Pure-JAX reference mirroring the PyTorch code exactly (f32-accurate)."""
    B, N, K, D = neighbor_vector.shape
    HI = jax.lax.Precision.HIGHEST
    ev_rep = jnp.broadcast_to(extra_vector[:, :, None, :], (B, N, K, D))
    cat = jnp.concatenate([ev_rep * neighbor_vector,
                           neighbor_weight[..., None]], axis=-1)      # (B,N,K,D+1)
    alpha = jnp.matmul(cat, w1, precision=HI)                         # (B,N,K,D)
    alpha = jnp.where(alpha >= 0, alpha, 0.2 * alpha)                 # leaky_relu 0.2
    alpha = jnp.matmul(alpha, w2, precision=HI)[..., 0]               # (B,N,K)
    alpha = jax.nn.softmax(alpha, axis=-1)[..., None]                 # (B,N,K,1)
    return jnp.sum(alpha * neighbor_vector, axis=-2)                  # (B,N,D)


if __name__ == "__main__":
    B, N, K, D = 2, 8, 4, 32     # K*D = 128 -> fully lane-dense packing
    key = jax.random.PRNGKey(0)
    k1, k2, k3, k4, k5, k6, k7 = jax.random.split(key, 7)

    # Module parameter shapes: w_1 (D+1,D), w_2 (D,1), w_3 (2D,D), bias (D)
    # (w_3 / bias unused by this forward path).
    params = {
        "w_1": jax.random.normal(k1, (D + 1, D), jnp.float32) * 0.1,
        "w_2": jax.random.normal(k2, (D, 1), jnp.float32) * 0.1,
        "w_3": jax.random.normal(k3, (2 * D, D), jnp.float32) * 0.1,
        "bias": jnp.zeros((D,), jnp.float32),
    }

    self_vectors = jax.random.normal(k4, (B, N, D), jnp.float32)       # unused by fwd
    neighbor_vector = jax.random.normal(k5, (B, N, K, D), jnp.float32)
    neighbor_weight = jax.random.normal(k6, (B, N, K), jnp.float32)
    extra_vector = jax.random.normal(k7, (B, N, D), jnp.float32)
    masks = jnp.ones((B, N), jnp.float32)                              # unused by fwd

    # Branch 1: attention-weighted aggregation (extra_vector given).
    out = global_aggregator_forward(self_vectors, neighbor_vector, B, masks,
                                    neighbor_weight, params,
                                    extra_vector=extra_vector)
    out = jax.block_until_ready(out)
    ref = _reference_forward(neighbor_vector, neighbor_weight, extra_vector,
                             params["w_1"], params["w_2"])
    assert out.shape == (B, N, D)
    assert jnp.allclose(out, ref, atol=2e-5, rtol=2e-5), "mismatch vs reference"

    # Branch 2: plain mean over neighbors (extra_vector=None).
    out_mean = global_aggregator_forward(self_vectors, neighbor_vector, B, masks,
                                         neighbor_weight, params,
                                         extra_vector=None)
    out_mean = jax.block_until_ready(out_mean)
    ref_mean = jnp.mean(neighbor_vector, axis=2)
    assert jnp.allclose(out_mean, ref_mean, atol=2e-5, rtol=2e-5), "mean mismatch"

    print("KERNEL_OK")
</pallas_src>

<mosaic_0001>
module attributes {stable_mosaic.version = 11 : i64} {
  func.func @_global_agg_kernel(%arg0: i32, %arg1: memref<16x32xf32, #tpu.memory_space<vmem>>, %arg2: memref<16x128xf32, #tpu.memory_space<vmem>>, %arg3: memref<16x4xf32, #tpu.memory_space<vmem>>, %arg4: memref<32x128xf32, #tpu.memory_space<vmem>>, %arg5: memref<128x128xf32, #tpu.memory_space<vmem>>, %arg6: memref<4x128xf32, #tpu.memory_space<vmem>>, %arg7: memref<128x4xf32, #tpu.memory_space<vmem>>, %arg8: memref<4x128xf32, #tpu.memory_space<vmem>>, %arg9: memref<128x32xf32, #tpu.memory_space<vmem>>, %arg10: memref<16x32xf32, #tpu.memory_space<vmem>>) attributes {dimension_semantics = [#tpu.dimension_semantics<parallel>], iteration_bounds = array<i64: 1>, scalar_prefetch = 0 : i64, scratch_operands = 0 : i64, tpu.core_type = #tpu.core_type<tc>, window_params = [{transform_indices = @transform_0, window_bounds = array<i64: 16, 32>}, {transform_indices = @transform_1, window_bounds = array<i64: 16, 128>}, {transform_indices = @transform_2, window_bounds = array<i64: 16, 4>}, {pipeline_mode = #tpu.pipeline_mode<synchronous>, transform_indices = @transform_3, window_bounds = array<i64: 32, 128>}, {pipeline_mode = #tpu.pipeline_mode<synchronous>, transform_indices = @transform_4, window_bounds = array<i64: 128, 128>}, {pipeline_mode = #tpu.pipeline_mode<synchronous>, transform_indices = @transform_5, window_bounds = array<i64: 4, 128>}, {pipeline_mode = #tpu.pipeline_mode<synchronous>, transform_indices = @transform_6, window_bounds = array<i64: 128, 4>}, {pipeline_mode = #tpu.pipeline_mode<synchronous>, transform_indices = @transform_7, window_bounds = array<i64: 4, 128>}, {pipeline_mode = #tpu.pipeline_mode<synchronous>, transform_indices = @transform_8, window_bounds = array<i64: 128, 32>}, {transform_indices = @transform_9, window_bounds = array<i64: 16, 32>}]} {
    %c0 = arith.constant 0 : index
    %c0_0 = arith.constant 0 : index
    %0 = vector.load %arg1[%c0, %c0_0] : memref<16x32xf32, #tpu.memory_space<vmem>>, vector<16x32xf32>
    %c0_1 = arith.constant 0 : index
    %c0_2 = arith.constant 0 : index
    %1 = vector.load %arg2[%c0_1, %c0_2] : memref<16x128xf32, #tpu.memory_space<vmem>>, vector<16x128xf32>
    %c0_3 = arith.constant 0 : index
    %c0_4 = arith.constant 0 : index
    %2 = vector.load %arg3[%c0_3, %c0_4] : memref<16x4xf32, #tpu.memory_space<vmem>>, vector<16x4xf32>
    %c0_5 = arith.constant 0 : index
    %c0_6 = arith.constant 0 : index
    %3 = vector.load %arg4[%c0_5, %c0_6] : memref<32x128xf32, #tpu.memory_space<vmem>>, vector<32x128xf32>
    %cst = arith.constant dense<0.000000e+00> : vector<16x128xf32>
    %4 = tpu.matmul %0, %3, %cst {dimension_numbers = #tpu.dot_dimension_numbers<[1], [0], [0], [1], [0, 0, 1, 1], [], []>, precision = #tpu.contract_precision<fp32>} : vector<16x32xf32>, vector<32x128xf32>, vector<16x128xf32> -> vector<16x128xf32>
    %5 = arith.mulf %4, %1 : vector<16x128xf32>
    %c0_7 = arith.constant 0 : index
    %c0_8 = arith.constant 0 : index
    %6 = vector.load %arg5[%c0_7, %c0_8] : memref<128x128xf32, #tpu.memory_space<vmem>>, vector<128x128xf32>
    %cst_9 = arith.constant dense<0.000000e+00> : vector<16x128xf32>
    %7 = tpu.matmul %5, %6, %cst_9 {dimension_numbers = #tpu.dot_dimension_numbers<[1], [0], [0], [1], [0, 0, 1, 1], [], []>, precision = #tpu.contract_precision<fp32>} : vector<16x128xf32>, vector<128x128xf32>, vector<16x128xf32> -> vector<16x128xf32>
    %c0_10 = arith.constant 0 : index
    %c0_11 = arith.constant 0 : index
    %8 = vector.load %arg6[%c0_10, %c0_11] : memref<4x128xf32, #tpu.memory_space<vmem>>, vector<4x128xf32>
    %cst_12 = arith.constant dense<0.000000e+00> : vector<16x128xf32>
    %9 = tpu.matmul %2, %8, %cst_12 {dimension_numbers = #tpu.dot_dimension_numbers<[1], [0], [0], [1], [0, 0, 1, 1], [], []>, precision = #tpu.contract_precision<fp32>} : vector<16x4xf32>, vector<4x128xf32>, vector<16x128xf32> -> vector<16x128xf32>
    %10 = arith.addf %7, %9 : vector<16x128xf32>
    %cst_13 = arith.constant 0.000000e+00 : f32
    %11 = vector.broadcast %cst_13 : f32 to vector<16x128xf32>
    %12 = arith.cmpf oge, %10, %11 : vector<16x128xf32>
    %cst_14 = arith.constant 2.000000e-01 : f32
    %13 = vector.broadcast %cst_14 : f32 to vector<16x128xf32>
    %14 = arith.mulf %13, %10 : vector<16x128xf32>
    %15 = arith.select %12, %10, %14 : vector<16x128xi1>, vector<16x128xf32>
    %c0_15 = arith.constant 0 : index
    %c0_16 = arith.constant 0 : index
    %16 = vector.load %arg7[%c0_15, %c0_16] : memref<128x4xf32, #tpu.memory_space<vmem>>, vector<128x4xf32>
    %cst_17 = arith.constant dense<0.000000e+00> : vector<16x4xf32>
    %17 = tpu.matmul %15, %16, %cst_17 {dimension_numbers = #tpu.dot_dimension_numbers<[1], [0], [0], [1], [0, 0, 1, 1], [], []>, precision = #tpu.contract_precision<fp32>} : vector<16x128xf32>, vector<128x4xf32>, vector<16x4xf32> -> vector<16x4xf32>
    %cst_18 = arith.constant dense<0xFF800000> : vector<16xf32>
    %18 = vector.multi_reduction <maximumf>, %17, %cst_18 [1] : vector<16x4xf32> to vector<16xf32>
    %19 = vector.shape_cast %18 : vector<16xf32> to vector<16x1xf32>
    %20 = vector.broadcast %19 : vector<16x1xf32> to vector<16x4xf32>
    %21 = arith.subf %17, %20 : vector<16x4xf32>
    %22 = math.exp %21 : vector<16x4xf32>
    %cst_19 = arith.constant dense<0.000000e+00> : vector<16xf32>
    %23 = vector.multi_reduction <add>, %22, %cst_19 [1] : vector<16x4xf32> to vector<16xf32>
    %24 = vector.shape_cast %23 : vector<16xf32> to vector<16x1xf32>
    %25 = vector.broadcast %24 : vector<16x1xf32> to vector<16x4xf32>
    %26 = arith.divf %22, %25 : vector<16x4xf32>
    %c0_20 = arith.constant 0 : index
    %c0_21 = arith.constant 0 : index
    %27 = vector.load %arg8[%c0_20, %c0_21] : memref<4x128xf32, #tpu.memory_space<vmem>>, vector<4x128xf32>
    %cst_22 = arith.constant dense<0.000000e+00> : vector<16x128xf32>
    %28 = tpu.matmul %26, %27, %cst_22 {dimension_numbers = #tpu.dot_dimension_numbers<[1], [0], [0], [1], [0, 0, 1, 1], [], []>, precision = #tpu.contract_precision<fp32>} : vector<16x4xf32>, vector<4x128xf32>, vector<16x128xf32> -> vector<16x128xf32>
    %29 = arith.mulf %28, %1 : vector<16x128xf32>
    %c0_23 = arith.constant 0 : index
    %c0_24 = arith.constant 0 : index
    %30 = vector.load %arg9[%c0_23, %c0_24] : memref<128x32xf32, #tpu.memory_space<vmem>>, vector<128x32xf32>
    %cst_25 = arith.constant dense<0.000000e+00> : vector<16x32xf32>
    %31 = tpu.matmul %29, %30, %cst_25 {dimension_numbers = #tpu.dot_dimension_numbers<[1], [0], [0], [1], [0, 0, 1, 1], [], []>, precision = #tpu.contract_precision<fp32>} : vector<16x128xf32>, vector<128x32xf32>, vector<16x32xf32> -> vector<16x32xf32>
    %c0_26 = arith.constant 0 : index
    %c0_27 = arith.constant 0 : index
    %32 = vector.load %arg10[%c0_26, %c0_27] : memref<16x32xf32, #tpu.memory_space<vmem>>, vector<16x32xf32>
    tpu.vector_store %arg10[%c0_26, %c0_27], %31 {strides = array<i32>} : memref<16x32xf32, #tpu.memory_space<vmem>>, vector<16x32xf32>,
    return
  }
  func.func @transform_0(%arg0: i32) -> (i32, i32) {
    %c0_i32 = arith.constant 0 : i32
    %c0_i32_0 = arith.constant 0 : i32
    return %arg0, %c0_i32 : i32, i32
  }
  func.func @transform_1(%arg0: i32) -> (i32, i32) {
    %c0_i32 = arith.constant 0 : i32
    %c0_i32_0 = arith.constant 0 : i32
    return %arg0, %c0_i32 : i32, i32
  }
  func.func @transform_2(%arg0: i32) -> (i32, i32) {
    %c0_i32 = arith.constant 0 : i32
    %c0_i32_0 = arith.constant 0 : i32
    return %arg0, %c0_i32 : i32, i32
  }
  func.func @transform_3(%arg0: i32) -> (i32, i32) {
    %c0_i32 = arith.constant 0 : i32
    %c0_i32_0 = arith.constant 0 : i32
    %c0_i32_1 = arith.constant 0 : i32
    return %c0_i32, %c0_i32_0 : i32, i32
  }
  func.func @transform_4(%arg0: i32) -> (i32, i32) {
    %c0_i32 = arith.constant 0 : i32
    %c0_i32_0 = arith.constant 0 : i32
    %c0_i32_1 = arith.constant 0 : i32
    return %c0_i32, %c0_i32_0 : i32, i32
  }
  func.func @transform_5(%arg0: i32) -> (i32, i32) {
    %c0_i32 = arith.constant 0 : i32
    %c0_i32_0 = arith.constant 0 : i32
    %c0_i32_1 = arith.constant 0 : i32
    return %c0_i32, %c0_i32_0 : i32, i32
  }
  func.func @transform_6(%arg0: i32) -> (i32, i32) {
    %c0_i32 = arith.constant 0 : i32
    %c0_i32_0 = arith.constant 0 : i32
    %c0_i32_1 = arith.constant 0 : i32
    return %c0_i32, %c0_i32_0 : i32, i32
  }
  func.func @transform_7(%arg0: i32) -> (i32, i32) {
    %c0_i32 = arith.constant 0 : i32
    %c0_i32_0 = arith.constant 0 : i32
    %c0_i32_1 = arith.constant 0 : i32
    return %c0_i32, %c0_i32_0 : i32, i32
  }
  func.func @transform_8(%arg0: i32) -> (i32, i32) {
    %c0_i32 = arith.constant 0 : i32
    %c0_i32_0 = arith.constant 0 : i32
    %c0_i32_1 = arith.constant 0 : i32
    return %c0_i32, %c0_i32_0 : i32, i32
  }
  func.func @transform_9(%arg0: i32) -> (i32, i32) {
    %c0_i32 = arith.constant 0 : i32
    %c0_i32_0 = arith.constant 0 : i32
    return %arg0, %c0_i32 : i32, i32
  }
}

</mosaic_0001>

<bundles_post_ra>
// kernel: tpu_custom_call.1
= control target key start
LH: loop header
LB: loop body
LE: loop exit
PB: predicated region body
PF: predicated region fallthrough
CT: control target
= control target key end

     0   :  { %vm43_vm0 = vcmask 261120   ;;  %vm604_vm1 = vcmask 1043456   ;;  %s6888_s0 = inlined_call_operand.vmem [shape: f32[16,32], index: 0, kind: input, shape index: {}]   ;;  %s6889_s1 = inlined_call_operand.vmem [shape: f32[16,128], index: 1, kind: input, shape index: {}]   ;;  %s6890_s2 = inlined_call_operand.vmem [shape: f32[16,4], index: 2, kind: input, shape index: {}]   ;;  %s6891_s3 = inlined_call_operand.vmem [shape: f32[32,128], index: 3, kind: input, shape index: {}]   ;;  %s6892_s4 = inlined_call_operand.vmem [shape: f32[128,128], index: 4, kind: input, shape index: {}]   ;;  %s6893_s5 = inlined_call_operand.vmem [shape: f32[4,128], index: 5, kind: input, shape index: {}]   ;;  %s6894_s6 = inlined_call_operand.vmem [shape: f32[128,4], index: 6, kind: input, shape index: {}]   ;;  %s6895_s7 = inlined_call_operand.vmem [shape: f32[4,128], index: 7, kind: input, shape index: {}]   ;;  %s6896_s8 = inlined_call_operand.vmem [shape: f32[128,32], index: 8, kind: input, shape index: {}]   ;;  %s6897_s9 = inlined_call_operand.hbm [shape: f32[16,32], index: 9, kind: output, shape index: {}]  }
   0x1   :  { %v39_v0 = vld [vmem:[%s6891_s3] sm:$0xff]  ;;  %v40_v1 = vld [vmem:[%s6891_s3 + $0x8] sm:$0xff]  ;;  %v41_v2 = vld [vmem:[%s6891_s3 + $0x10] sm:$0xff] }
   0x2   :  { %v51_v3 = vand.u32 4294901760, %v39_v0  ;;  %v54_v4 = vand.u32 4294901760, %v40_v1  ;;  %v42_v5 = vld [vmem:[%s6891_s3 + $0x18] sm:$0xff]  ;;  %v57_v6 = vand.u32 4294901760, %v41_v2  ;;  %v33_v7 = vld [vmem:[%s6888_s0] sm:$0xff]  ;;  %v34_v8 = vld [vmem:[%s6888_s0 + $0x8] sm:$0xff] }
   0x3   :  { %v60_v9 = vand.u32 4294901760, %v42_v5  ;;  %v45_v10 = vsel %vm43_vm0, %v33_v7, 0  ;;  %v48_v11 = vsel %vm43_vm0, %v34_v8, 0  ;;  %v596_v20 = vld [vmem:[%s6893_s5] sm:$0xf] }
   0x4   :  { %v5676_v12 = vpack.c.bf16 %v54_v4, %v51_v3  ;;  %v5678_v13 = vand.u32 4294901760, %v45_v10  ;;  %v5680_v14 = vand.u32 4294901760, %v48_v11  ;;  %v5682_v15 = vsub.f32 %v39_v0, %v51_v3 }
   0x5   :  { %v5684_v16 = vpack.c.bf16 %v60_v9, %v57_v6  ;;  %v5686_v17 = vsub.f32 %v40_v1, %v54_v4  ;;  %v5688_v18 = vsub.f32 %v41_v2, %v57_v6  ;;  %v5690_v19 = vsub.f32 %v42_v5, %v60_v9 }
   0x6   :  { %4881 = vmatprep.subr.bf16.mxu0 %v5676_v12  ;;  %v5697_v21 = vsub.f32 %v45_v10, %v5678_v13  ;;  %v5700_v22 = vsub.f32 %v48_v11, %v5680_v14  ;;  %v142_v23 = vand.u32 4294901760, %v5682_v15  ;;  %v606_v30 = vsel %vm604_vm1, %v596_v20, 0 }
   0x7   :  { %4883 = vmatpush3.bf16.msra.mxu0 %v5676_v12  ;;  %v149_v24 = vand.u32 4294901760, %v5686_v17  ;;  %v156_v25 = vand.u32 4294901760, %v5688_v18  ;;  %v163_v26 = vand.u32 4294901760, %v5690_v19 }
   0x8   :  { %4885 = vmatprep.subr.bf16.mxu0 %v5684_v16  ;;  %v121_v27 = vand.u32 4294901760, %v5697_v21  ;;  %v131_v28 = vand.u32 4294901760, %v5700_v22  ;;  %v143_v29 = vsub.f32 %v5682_v15, %v142_v23 }
   0x9   :  { %14 = vsyncpa [#allocation3], 0  ;;  %v150_v31 = vsub.f32 %v5686_v17, %v149_v24  ;;  %v157_v32 = vsub.f32 %v5688_v18, %v156_v25  ;;  %v164_v33 = vsub.f32 %v5690_v19, %v163_v26  ;;  %v37_v34 = vld [vmem:[%s6890_s2] sm:$0xff]  ;;  %vm597_vm2 = vcmask 31744   ;;  %v38_v35 = vld [vmem:[%s6890_s2 + $0x8] sm:$0xff] }
   0xa   :  { %v122_v36 = vsub.f32 %v5697_v21, %v121_v27  ;;  %v132_v37 = vsub.f32 %v5700_v22, %v131_v28  ;;  %v144_v38 = vand.u32 4294901760, %v143_v29  ;;  %v5736_v42 = vand.u32 4294901760, %v606_v30  ;;  %v5781_v3 = vld [vmem:[%s6892_s4] sm:$0xff]  ;;  %v5786_v4 = vld [vmem:[%s6892_s4 + $0x8] sm:$0xff]  ;;  %v5797_v7 = vld [vmem:[%s6892_s4 + $0x10] sm:$0xff] }
   0xb   :  { %4887 = vmatpush3.bf16.msra.mxu0 %v5684_v16  ;;  %v151_v39 = vand.u32 4294901760, %v150_v31  ;;  %v158_v40 = vand.u32 4294901760, %v157_v32  ;;  %v165_v41 = vand.u32 4294901760, %v164_v33  ;;  %v599_v45 = vsel %vm597_vm2, %v37_v34, 0  ;;  %v5802_v8 = vld [vmem:[%s6892_s4 + $0x18] sm:$0xff]  ;;  %v592_v33 = vld [vmem:[%s6892_s4 + $0x60] sm:$0xff] }
   0xc   :  { %v123_v43 = vand.u32 4294901760, %v122_v36  ;;  %v133_v44 = vand.u32 4294901760, %v132_v37  ;;  %v602_v46 = vsel %vm597_vm2, %v38_v35, 0  ;;  %4190 = vmatprep.subr.mxu1 %v5736_v42  ;;  %v5741_v49 = vand.u32 4294901760, %v599_v45  ;;  %v593_v34 = vld [vmem:[%s6892_s4 + $0x68] sm:$0xff] }
   0xd   :  { %v4888_v47 = vpack.c.bf16 %v151_v39, %v144_v38  ;;  %v4892_v48 = vpack.c.bf16 %v165_v41, %v158_v40  ;;  %v5743_v50 = vand.u32 4294901760, %v602_v46  ;;  %4191 = vmatpush3.msra.mxu1 %v5736_v42  ;;  %v696_v51 = vsub.f32 %v606_v30, %v5736_v42  ;;  %v594_v38 = vld [vmem:[%s6892_s4 + $0x70] sm:$0xff]  ;;  %v595_v39 = vld [vmem:[%s6892_s4 + $0x78] sm:$0xff] }
   0xe   :  { %4132 = vmatprep.mubr.f32.mxu0 %v123_v43  ;;  %v675_v52 = vsub.f32 %v599_v45, %v5741_v49  ;;  %v4896_v55 = vpack.c.bf16 %v5686_v17, %v5682_v15  ;;  %v4900_v62 = vpack.c.bf16 %v5690_v19, %v5688_v18  ;;  %v4912_v1 = vpack.c.bf16 %v149_v24, %v142_v23  ;;  %v5840_v18 = vld [vmem:[%s6892_s4 + $0x30] sm:$0xff]  ;;  %v5869_v23 = vld [vmem:[%s6892_s4 + $0x48] sm:$0xff] }
   0xf   :  { %4133 = vmatmul.mubr.f32.vlgmr.msra.gmra.mrb[0].mxu0 %v133_v44  ;;  %4889 = vmatprep.subr.bf16.mxu0 %v4888_v47  ;;  %v685_v53 = vsub.f32 %v602_v46, %v5743_v50  ;;  %v697_v54 = vand.u32 4294901760, %v696_v51  ;;  %v4916_v2 = vpack.c.bf16 %v163_v26, %v156_v25  ;;  %v1098_v5 = vand.u32 4294901760, %v5781_v3 }
  0x10   :  { %4891 = vmatpush3.bf16.msra.mxu0 %v4888_v47  ;;  %4143 = vmatprep.mubr.f32.mxu0 %v5678_v13  ;;  %v676_v56 = vand.u32 4294901760, %v675_v52  ;;  %v1101_v6 = vand.u32 4294901760, %v5786_v4  ;;  %v1104_v10 = vand.u32 4294901760, %v5797_v7  ;;  %v1107_v11 = vand.u32 4294901760, %v5802_v8 }
  0x11   :  { %4893 = vmatprep.subr.bf16.mxu0 %v4892_v48  ;;  %v686_v57 = vand.u32 4294901760, %v685_v53  ;;  %v698_v58 = vsub.f32 %v696_v51, %v697_v54  ;;  %v1116_v20 = vand.u32 4294901760, %v5840_v18  ;;  %v1125_v26 = vand.u32 4294901760, %v5869_v23 }
  0x12   :  { %v677_v59 = vsub.f32 %v675_v52, %v676_v56  ;;  %v5811_v9 = vpack.c.bf16 %v1101_v6, %v1098_v5  ;;  %v5832_v15 = vpack.c.bf16 %v1107_v11, %v1104_v10  ;;  %v1134_v35 = vand.u32 4294901760, %v592_v33 }
  0x13   :  { %v687_v60 = vsub.f32 %v685_v53, %v686_v57  ;;  %v699_v61 = vand.u32 4294901760, %v698_v58  ;;  %v1137_v36 = vand.u32 4294901760, %v593_v34  ;;  %v1140_v40 = vand.u32 4294901760, %v594_v38 }
  0x14   :  { %4895 = vmatpush3.bf16.msra.mxu0 %v4892_v48  ;;  %v678_v63 = vand.u32 4294901760, %v677_v59  ;;  %v1143_v41 = vand.u32 4294901760, %v595_v39  ;;  %v1200_v43 = vsub.f32 %v5781_v3, %v1098_v5  ;;  %v1207_v44 = vsub.f32 %v5786_v4, %v1101_v6 }
  0x15   :  { %4897 = vmatprep.subr.bf16.mxu0 %v4896_v55  ;;  %v688_v0 = vand.u32 4294901760, %v687_v60  ;;  %4195 = vmatprep.subr.mxu1 %v699_v61  ;;  %v5929_v37 = vpack.c.bf16 %v1137_v36, %v1134_v35  ;;  %v1298_v58 = vsub.f32 %v594_v38, %v1140_v40 }
  0x16   :  { %4192 = vmatprep.mubr.f32.mxu1 %v678_v63  ;;  %v1201_v45 = vand.u32 4294901760, %v1200_v43  ;;  %v1208_v46 = vand.u32 4294901760, %v1207_v44  ;;  %v1305_v59 = vsub.f32 %v595_v39, %v1143_v41  ;;  %v5976_v39 = vsub.f32 %v5797_v7, %v1104_v10 }
  0x17   :  { %4144 = vmatmul.mubr.f32.vlgmr.msra.gmra.mrb[0].mxu0 %v5680_v14  ;;  %4193 = vmatmul.mubr.f32.vlgmr.msra.gmra.mrb[0].mxu1 %v688_v0  ;;  %v1299_v63 = vand.u32 4294901760, %v1298_v58 }
  0x18   :  { %4899 = vmatpush3.bf16.msra.mxu0 %v4896_v55  ;;  %4154 = vmatprep.mubr.f32.mxu0 %v5697_v21  ;;  %v5953_v47 = vpack.c.bf16 %v1208_v46, %v1201_v45  ;;  %v1202_v48 = vsub.f32 %v1200_v43, %v1201_v45  ;;  %v1306_v0 = vand.u32 4294901760, %v1305_v59  ;;  %v5971_v38 = vpack.c.bf16 %v1305_v59, %v1298_v58 }
  0x19   :  { %4901 = vmatprep.subr.bf16.mxu0 %v4900_v62  ;;  %4196 = vmatpush3.msra.mxu1 %v699_v61  ;;  %v1300_v3 = vsub.f32 %v1298_v58, %v1299_v63 }
  0x1a   :  { %4197 = vmatprep.mubr.f32.mxu1 %v5741_v49  ;;  %4200 = vmatprep.subr.mxu1 %v696_v51  ;;  %v1307_v4 = vsub.f32 %v1305_v59, %v1306_v0 }
  0x1b   :  { %v1301_v6 = vand.u32 4294901760, %v1300_v3 }
  0x1c   :  { %4903 = vmatpush3.bf16.msra.mxu0 %v4900_v62 }
  0x1d   :  { %4905 = vmatprep.subr.bf16.mxu0 %v5676_v12 }
  0x1f   :  { %4155 = vmatmul.mubr.f32.vlgmr.msra.gmra.mrb[0].mxu0 %v5700_v22  ;;  %4198 = vmatmul.mubr.f32.vlgmr.msra.gmra.mrb[0].mxu1 %v5743_v50  ;;  %v5864_v22 = vld [vmem:[%s6892_s4 + $0x40] sm:$0xff] }
  0x20   :  { %4907 = vmatpush3.bf16.msra.mxu0 %v5676_v12  ;;  %4165 = vmatprep.mubr.f32.mxu0 %v121_v27  ;;  %v1122_v25 = vand.u32 4294901760, %v5864_v22  ;;  %v5884_v27 = vld [vmem:[%s6892_s4 + $0x50] sm:$0xff] }
  0x21   :  { %4909 = vmatprep.subr.bf16.mxu0 %v5684_v16  ;;  %4201 = vmatpush3.msra.mxu1 %v696_v51  ;;  %v1128_v30 = vand.u32 4294901760, %v5884_v27 }
  0x22   :  { %4202 = vmatprep.mubr.f32.mxu1 %v675_v52  ;;  %4205 = vmatprep.subr.mxu1 %v5736_v42  ;;  %v5899_v29 = vpack.c.bf16 %v1125_v26, %v1122_v25 }
  0x24   :  { %4911 = vmatpush3.bf16.msra.mxu0 %v5684_v16 }
  0x25   :  { %4913 = vmatprep.subr.bf16.mxu0 %v4912_v1 }
  0x27   :  { %4166 = vmatmul.mubr.f32.vlgmr.msra.gmra.mrb[0].mxu0 %v131_v28  ;;  %4203 = vmatmul.mubr.f32.vlgmr.msra.gmra.mrb[0].mxu1 %v685_v53  ;;  %v5889_v28 = vld [vmem:[%s6892_s4 + $0x58] sm:$0xff]  ;;  %v1284_v53 = vsub.f32 %v592_v33, %v1134_v35  ;;  %v1308_v33 = vand.u32 4294901760, %v1307_v4  ;;  %v5967_v35 = vpack.c.bf16 %v1207_v44, %v1200_v43  ;;  %v1215_v43 = vand.u32 4294901760, %v5976_v39 }
  0x28   :  { %4915 = vmatpush3.bf16.msra.mxu0 %v4912_v1  ;;  %4176 = vmatprep.mubr.f32.mxu0 %v5678_v13  ;;  %v1131_v31 = vand.u32 4294901760, %v5889_v28 }
  0x29   :  { %4917 = vmatprep.subr.bf16.mxu0 %v4916_v2  ;;  %4206 = vmatpush3.msra.mxu1 %v5736_v42  ;;  %v1285_v55 = vand.u32 4294901760, %v1284_v53 }
  0x2a   :  { %4207 = vmatprep.mubr.f32.mxu1 %v676_v56  ;;  %4210 = vmatprep.subr.mxu1 %v697_v54  ;;  %v5911_v32 = vpack.c.bf16 %v1131_v31, %v1128_v30 }
  0x2c   :  { %4919 = vmatpush3.bf16.msra.mxu0 %v4916_v2  ;;  %v5961_v2 = vpack.c.bf16 %v1306_v0, %v1299_v63  ;;  %v6040_v0 = vsub.f32 %v5869_v23, %v1125_v26 }
  0x2d   :  { %4921 = vmatprep.subr.bf16.mxu0 %v5676_v12 }
  0x2f   :  { %4177 = vmatmul.mubr.f32.vlgmr.msra.gmra.mrb[0].mxu0 %v5680_v14  ;;  %4208 = vmatmul.mubr.f32.vlgmr.msra.gmra.mrb[0].mxu1 %v686_v57  ;;  %v1286_v57 = vsub.f32 %v1284_v53, %v1285_v55 }
  0x30   :  { %4923 = vmatpush3.bf16.msra.mxu0 %v5676_v12  ;;  %4187 = vmatprep.mubr.f32.mxu0 %v5678_v13  ;;  %v5819_v12 = vld [vmem:[%s6892_s4 + $0x20] sm:$0xff]  ;;  %v5824_v13 = vld [vmem:[%s6892_s4 + $0x28] sm:$0xff] }
  0x31   :  { %4925 = vmatprep.subr.bf16.mxu0 %v5684_v16  ;;  %4211 = vmatpush3.msra.mxu1 %v697_v54  ;;  %v1113_v17 = vand.u32 4294901760, %v5824_v13  ;;  %v1291_v54 = vsub.f32 %v593_v34, %v1137_v36  ;;  %v1287_v62 = vand.u32 4294901760, %v1286_v57  ;;  %v5965_v34 = vpack.c.bf16 %v1308_v33, %v1301_v6 }
  0x32   :  { %4212 = vmatprep.mubr.f32.mxu1 %v5741_v49  ;;  %4215 = vmatprep.subr.mxu1 %v5736_v42 }
  0x33   :  { %v1292_v56 = vand.u32 4294901760, %v1291_v54  ;;  %v5969_v36 = vpack.c.bf16 %v1291_v54, %v1284_v53 }
  0x34   :  { %4927 = vmatpush3.bf16.msra.mxu0 %v5684_v16  ;;  %v1110_v16 = vand.u32 4294901760, %v5819_v12 }
  0x35   :  { %4929 = vmatprep.subr.bf16.mxu0 %v5811_v9  ;;  %v5959_v60 = vpack.c.bf16 %v1292_v56, %v1285_v55  ;;  %v1293_v61 = vsub.f32 %v1291_v54, %v1292_v56 }
  0x36   :  { %v5856_v19 = vpack.c.bf16 %v1113_v17, %v1110_v16  ;;  %v5994_v7 = vsub.f32 %v5819_v12, %v1110_v16 }
  0x37   :  { %4188 = vmatmul.mubr.f32.vlgmr.msra.gmra.mrb[0].mxu0 %v5680_v14  ;;  %v5845_v14 = vld [vmem:[%s6892_s4 + $0x38] sm:$0xff]  ;;  %4213 = vmatmul.mubr.f32.vlgmr.msra.gmra.mrb[0].mxu1 %v5743_v50  ;;  %v1294_v1 = vand.u32 4294901760, %v1293_v61 }
  0x38   :  { %4931 = vmatpush3.bf16.msra.mxu0 %v5811_v9  ;;  %4216 = vmatpush3.msra.mxu1 %v5736_v42  ;;  %v1119_v21 = vand.u32 4294901760, %v5845_v14  ;;  %v5941_v42 = vpack.c.bf16 %v1143_v41, %v1140_v40  ;;  %v5981_v40 = vsub.f32 %v5802_v8, %v1107_v11  ;;  %v36_v41 = vld [vmem:[%s6889_s1 + $0x8] sm:$0xff]  ;;  %v5999_v8 = vsub.f32 %v5824_v13, %v1113_v17 }
  0x39   :  { %4933 = vmatprep.subr.bf16.mxu0 %v5832_v15  ;;  %4217 = vmatprep.mubr.f32.mxu1 %v5741_v49  ;;  %v1209_v49 = vsub.f32 %v1207_v44, %v1208_v46  ;;  %v5963_v5 = vpack.c.bf16 %v1294_v1, %v1287_v62  ;;  %v35_v44 = vld [vmem:[%s6889_s1] sm:$0xff]  ;;  %v1229_v53 = vand.u32 4294901760, %v5994_v7  ;;  %v6012_v13 = vsub.f32 %v5840_v18, %v1116_v20 }
  0x3a   :  { %5025 = vmatprep.subr.bf16.mxu1 %v5811_v9  ;;  %v5876_v24 = vpack.c.bf16 %v1119_v21, %v1116_v20  ;;  %v1222_v45 = vand.u32 4294901760, %v5981_v40  ;;  %v1236_v12 = vand.u32 4294901760, %v5999_v8  ;;  %v6017_v17 = vsub.f32 %v5845_v14, %v1119_v21 }
  0x3b   :  { %v1210_v51 = vand.u32 4294901760, %v1209_v49  ;;  %v1216_v49 = vsub.f32 %v5976_v39, %v1215_v43  ;;  %v1230_v59 = vsub.f32 %v5994_v7, %v1229_v53  ;;  %v1243_v61 = vand.u32 4294901760, %v6012_v13 }
  0x3c   :  { %4935 = vmatpush3.bf16.msra.mxu0 %v5832_v15  ;;  %v1237_v18 = vsub.f32 %v5999_v8, %v1236_v12  ;;  %v1250_v14 = vand.u32 4294901760, %v6017_v17  ;;  %v6034_v21 = vsub.f32 %v5864_v22, %v1122_v25  ;;  %v5060_v63 = vpack.c.bf16 %v1222_v45, %v1215_v43 }
  0x3d   :  { %4937 = vmatprep.subr.bf16.mxu0 %v5856_v19  ;;  %v1217_v56 = vand.u32 4294901760, %v1216_v49  ;;  %v1231_v6 = vand.u32 4294901760, %v1230_v59  ;;  %v1244_v25 = vsub.f32 %v6012_v13, %v1243_v61 }
  0x3e   :  { %v1238_v33 = vand.u32 4294901760, %v1237_v18  ;;  %v1251_v23 = vsub.f32 %v6017_v17, %v1250_v14  ;;  %v1257_v26 = vand.u32 4294901760, %v6034_v21 }
  0x3f   :  { %4218 = vmatmul.mubr.f32.vlgmr.msra.gmra.mrb[0].mxu1 %v5743_v50  ;;  %v1203_v50 = vand.u32 4294901760, %v1202_v48 }
  0x40   :  { %4939 = vmatpush3.bf16.msra.mxu0 %v5856_v19  ;;  %5027 = vmatpush3.bf16.msra.mxu1 %v5811_v9  ;;  %v1252_v49 = vand.u32 4294901760, %v1251_v23  ;;  %v1800_v23 = vld [vmem:[%s6894_s6 + $0x68] sm:$0xff] }
  0x41   :  { %4941 = vmatprep.subr.bf16.mxu0 %v5876_v24  ;;  %5029 = vmatprep.subr.bf16.mxu1 %v5832_v15  ;;  %v5956_v52 = vpack.c.bf16 %v1210_v51, %v1203_v50  ;;  %v1223_v51 = vsub.f32 %v5981_v40, %v1222_v45  ;;  %v6056_v45 = vsub.f32 %v5884_v27, %v1128_v30 }
  0x42   :  { %v1258_v27 = vsub.f32 %v6034_v21, %v1257_v26 }
  0x43   :  { %v1224_v58 = vand.u32 4294901760, %v1223_v51 }
  0x44   :  { %4943 = vmatpush3.bf16.msra.mxu0 %v5876_v24  ;;  %5031 = vmatpush3.bf16.msra.mxu1 %v5832_v15 }
  0x45   :  { %4945 = vmatprep.subr.bf16.mxu0 %v5899_v29  ;;  %5033 = vmatprep.subr.bf16.mxu1 %v5856_v19  ;;  %v4964_v4 = vpack.c.bf16 %v1224_v58, %v1217_v56 }
  0x48   :  { %4947 = vmatpush3.bf16.msra.mxu0 %v5899_v29  ;;  %5035 = vmatpush3.bf16.msra.mxu1 %v5856_v19 }
  0x49   :  { %4949 = vmatprep.subr.bf16.mxu0 %v5911_v32  ;;  %5037 = vmatprep.subr.bf16.mxu1 %v5876_v24 }
  0x4c   :  { %4951 = vmatpush3.bf16.msra.mxu0 %v5911_v32  ;;  %5039 = vmatpush3.bf16.msra.mxu1 %v5876_v24 }
  0x4d   :  { %5041 = vmatprep.subr.bf16.mxu1 %v5899_v29  ;;  %4953 = vmatprep.subr.bf16.mxu0 %v5929_v37 }
  0x50   :  { %5043 = vmatpush3.bf16.msra.mxu1 %v5899_v29  ;;  %4955 = vmatpush3.bf16.msra.mxu0 %v5929_v37 }
  0x51   :  { %5045 = vmatprep.subr.bf16.mxu1 %v5911_v32  ;;  %4957 = vmatprep.subr.bf16.mxu0 %v5941_v42 }
  0x54   :  { %5047 = vmatpush3.bf16.msra.mxu1 %v5911_v32  ;;  %4959 = vmatpush3.bf16.msra.mxu0 %v5941_v42 }
  0x55   :  { %5049 = vmatprep.subr.bf16.mxu1 %v5929_v37  ;;  %4961 = vmatprep.subr.bf16.mxu0 %v5956_v52 }
  0x58   :  { %5051 = vmatpush3.bf16.msra.mxu1 %v5929_v37 }
  0x59   :  { %5053 = vmatprep.subr.bf16.mxu1 %v5941_v42 }
  0x5c   :  { %5055 = vmatpush3.bf16.msra.mxu1 %v5941_v42 }
  0x5d   :  { %5057 = vmatprep.subr.bf16.mxu1 %v5953_v47 }
 0x10a   :  { %v4189_v10 = vpop.f32.mrb[0].mxu0 }
 0x10b   :  { %v579_v11 = vmul.f32 %v4189_v10, %v36_v41  ;;  %v568_v46 = vpop.f32.mrb[1].mxu0  ;;  %v5064_v10 = vpack.c.bf16 %v1236_v12, %v1229_v53  ;;  %v1259_v53 = vand.u32 4294901760, %v1258_v27 }
 0x10c   :  { %v578_v48 = vmul.f32 %v568_v46, %v35_v44  ;;  %v1264_v44 = vand.u32 4294901760, %v6040_v0  ;;  %v5068_v46 = vpack.c.bf16 %v1250_v14, %v1243_v61  ;;  %v1795_v14 = vld [vmem:[%s6894_s6 + $0x40] sm:$0xff] }
 0x10d   :  { %v6002_v50 = vand.u32 4294901760, %v579_v11 }
 0x10e   :  { %v6007_v16 = vand.u32 4294901760, %v578_v48  ;;  %v1265_v30 = vsub.f32 %v6040_v0, %v1264_v44  ;;  %v5072_v51 = vpack.c.bf16 %v1264_v44, %v1257_v26 }
 0x10f   :  { %v6020_v54 = vsub.f32 %v579_v11, %v6002_v50  ;;  %v4968_v11 = vpack.c.bf16 %v1238_v33, %v1231_v6 }
 0x110   :  { %v6023_v55 = vsub.f32 %v578_v48, %v6007_v16  ;;  %v1245_v48 = vand.u32 4294901760, %v1244_v25  ;;  %v1266_v12 = vand.u32 4294901760, %v1265_v30  ;;  %v1799_v25 = vld [vmem:[%s6894_s6 + $0x60] sm:$0xff] }
 0x111   :  { %v1190_v57 = vand.u32 4294901760, %v6020_v54  ;;  %v1840_v26 = vand.u32 4294901760, %v1799_v25 }
 0x112   :  { %v1180_v20 = vand.u32 4294901760, %v6023_v55  ;;  %v6043_v3 = vpop.f32.mrb[0].mxu1  ;;  %v4976_v58 = vpack.c.bf16 %v1266_v12, %v1259_v53 }
 0x113   :  { %v1191_v62 = vsub.f32 %v6020_v54, %v1190_v57  ;;  %v6045_v41 = vpop.f32.mrb[1].mxu1 }
 0x114   :  { %4357 = vmatprep.mubr.f32.mxu1 %v1180_v20  ;;  %v1181_v1 = vsub.f32 %v6023_v55, %v1180_v20 }
 0x115   :  { %4358 = vmatmul.mubr.f32.vlgmr.msra.gmra.mrb[2].mxu1 %v1190_v57  ;;  %v1192_v43 = vand.u32 4294901760, %v1191_v62  ;;  %v1828_v62 = vand.u32 4294901760, %v1795_v14 }
 0x116   :  { %5059 = vmatpush3.bf16.msra.mxu1 %v5953_v47  ;;  %4392 = vmatprep.mubr.f32.mxu1 %v6007_v16  ;;  %v1182_v22 = vand.u32 4294901760, %v1181_v1  ;;  %v6061_v47 = vsub.f32 %v5889_v28, %v1131_v31  ;;  %v1271_v28 = vand.u32 4294901760, %v6056_v45  ;;  %v1797_v1 = vld [vmem:[%s6894_s6 + $0x50] sm:$0xff] }
 0x117   :  { %5061 = vmatprep.subr.bf16.mxu1 %v5060_v63  ;;  %v1834_v6 = vand.u32 4294901760, %v1797_v1 }
 0x118   :  { %4252 = vmatprep.mubr.f32.mxu0 %v1182_v22  ;;  %v1278_v31 = vand.u32 4294901760, %v6061_v47  ;;  %v1272_v56 = vsub.f32 %v6056_v45, %v1271_v28 }
 0x119   :  { %4253 = vmatmul.mubr.f32.vlgmr.msra.gmra.mrb[2].mxu0 %v1192_v43  ;;  %v1843_v43 = vand.u32 4294901760, %v1800_v23 }
 0x11a   :  { %4963 = vmatpush3.bf16.msra.mxu0 %v5956_v52  ;;  %5063 = vmatpush3.bf16.msra.mxu1 %v5060_v63  ;;  %v4972_v52 = vpack.c.bf16 %v1252_v49, %v1245_v48  ;;  %v1279_v57 = vsub.f32 %v6061_v47, %v1278_v31  ;;  %v5076_v59 = vpack.c.bf16 %v1278_v31, %v1271_v28  ;;  %v1273_v18 = vand.u32 4294901760, %v1272_v56 }
 0x11b   :  { %4287 = vmatprep.mubr.f32.mxu0 %v6007_v16  ;;  %4965 = vmatprep.subr.bf16.mxu0 %v4964_v4  ;;  %v6203_v44 = vpack.c.bf16 %v1843_v43, %v1840_v26 }
 0x11c   :  { %5065 = vmatprep.subr.bf16.mxu1 %v5064_v10  ;;  %v1280_v20 = vand.u32 4294901760, %v1279_v57 }
 0x11e   :  { %4967 = vmatpush3.bf16.msra.mxu0 %v4964_v4  ;;  %5067 = vmatpush3.bf16.msra.mxu1 %v5064_v10  ;;  %v4980_v61 = vpack.c.bf16 %v1280_v20, %v1273_v18  ;;  %v1798_v4 = vld [vmem:[%s6894_s6 + $0x58] sm:$0xff]  ;;  %v1801_v10 = vld [vmem:[%s6894_s6 + $0x70] sm:$0xff]  ;;  %v6244_v20 = vsub.f32 %v1795_v14, %v1828_v62 }
 0x11f   :  { %4969 = vmatprep.subr.bf16.mxu0 %v4968_v11  ;;  %5069 = vmatprep.subr.bf16.mxu1 %v5068_v46  ;;  %v1837_v33 = vand.u32 4294901760, %v1798_v4 }
 0x121   :  { %v6193_v22 = vpack.c.bf16 %v1837_v33, %v1834_v6 }
 0x122   :  { %4971 = vmatpush3.bf16.msra.mxu0 %v4968_v11  ;;  %5071 = vmatpush3.bf16.msra.mxu1 %v5068_v46  ;;  %v1802_v11 = vld [vmem:[%s6894_s6 + $0x78] sm:$0xff]  ;;  %v1846_v46 = vand.u32 4294901760, %v1801_v10 }
 0x123   :  { %4973 = vmatprep.subr.bf16.mxu0 %v4972_v52  ;;  %5073 = vmatprep.subr.bf16.mxu1 %v5072_v51  ;;  %v1849_v48 = vand.u32 4294901760, %v1802_v11 }
 0x125   :  { %v6219_v30 = vpack.c.bf16 %v1849_v48, %v1846_v46 }
 0x126   :  { %4975 = vmatpush3.bf16.msra.mxu0 %v4972_v52  ;;  %5075 = vmatpush3.bf16.msra.mxu1 %v5072_v51 }
 0x127   :  { %4977 = vmatprep.subr.bf16.mxu0 %v4976_v58  ;;  %5077 = vmatprep.subr.bf16.mxu1 %v5076_v59 }
 0x12a   :  { %4979 = vmatpush3.bf16.msra.mxu0 %v4976_v58  ;;  %5079 = vmatpush3.bf16.msra.mxu1 %v5076_v59 }
 0x12b   :  { %4981 = vmatprep.subr.bf16.mxu0 %v4980_v61  ;;  %5081 = vmatprep.subr.bf16.mxu1 %v5959_v60 }
 0x12e   :  { %4983 = vmatpush3.bf16.msra.mxu0 %v4980_v61  ;;  %5083 = vmatpush3.bf16.msra.mxu1 %v5959_v60  ;;  %v4996_v60 = vpack.c.bf16 %v5981_v40, %v5976_v39 }
 0x12f   :  { %4985 = vmatprep.subr.bf16.mxu0 %v5963_v5  ;;  %5085 = vmatprep.subr.bf16.mxu1 %v5961_v2 }
 0x132   :  { %4987 = vmatpush3.bf16.msra.mxu0 %v5963_v5  ;;  %5087 = vmatpush3.bf16.msra.mxu1 %v5961_v2  ;;  %v5004_v2 = vpack.c.bf16 %v6017_v17, %v6012_v13  ;;  %v1794_v13 = vld [vmem:[%s6894_s6 + $0x38] sm:$0xff] }
 0x133   :  { %4989 = vmatprep.subr.bf16.mxu0 %v5965_v34  ;;  %5089 = vmatprep.subr.bf16.mxu1 %v5811_v9 }
 0x135   :  { %4393 = vmatmul.mubr.f32.vlgmr.msra.gmra.mrb[2].mxu1 %v6002_v50 }
 0x136   :  { %4991 = vmatpush3.bf16.msra.mxu0 %v5965_v34  ;;  %5091 = vmatpush3.bf16.msra.mxu1 %v5811_v9  ;;  %v5000_v9 = vpack.c.bf16 %v5999_v8, %v5994_v7  ;;  %v6137_v7 = vld [vmem:[%s6894_s6 + $0x20] sm:$0xff]  ;;  %v6142_v8 = vld [vmem:[%s6894_s6 + $0x28] sm:$0xff] }
 0x137   :  { %4427 = vmatprep.mubr.f32.mxu1 %v6007_v16  ;;  %4993 = vmatprep.subr.bf16.mxu0 %v5967_v35  ;;  %v1819_v16 = vand.u32 4294901760, %v6142_v8 }
 0x138   :  { %5093 = vmatprep.subr.bf16.mxu1 %v5832_v15 }
 0x139   :  { %4288 = vmatmul.mubr.f32.vlgmr.msra.gmra.mrb[2].mxu0 %v6002_v50 }
 0x13a   :  { %4995 = vmatpush3.bf16.msra.mxu0 %v5967_v35  ;;  %4322 = vmatprep.mubr.f32.mxu0 %v6023_v55  ;;  %v6125_v35 = vld [vmem:[%s6894_s6 + $0x18] sm:$0xff] }
 0x13b   :  { %5095 = vmatpush3.bf16.msra.mxu1 %v5832_v15  ;;  %4997 = vmatprep.subr.bf16.mxu0 %v4996_v60  ;;  %v5008_v15 = vpack.c.bf16 %v6040_v0, %v6034_v21  ;;  %v1813_v40 = vand.u32 4294901760, %v6125_v35  ;;  %v1796_v21 = vld [vmem:[%s6894_s6 + $0x48] sm:$0xff] }
 0x13c   :  { %5097 = vmatprep.subr.bf16.mxu1 %v5856_v19  ;;  %v1831_v63 = vand.u32 4294901760, %v1796_v21 }
 0x13e   :  { %4999 = vmatpush3.bf16.msra.mxu0 %v4996_v60  ;;  %v6183_v0 = vpack.c.bf16 %v1831_v63, %v1828_v62  ;;  %v6246_v61 = vsub.f32 %v1796_v21, %v1831_v63  ;;  %v6270_v62 = vsub.f32 %v1799_v25, %v1840_v26  ;;  %v6272_v63 = vsub.f32 %v1800_v23, %v1843_v43 }
 0x13f   :  { %5099 = vmatpush3.bf16.msra.mxu1 %v5856_v19  ;;  %5001 = vmatprep.subr.bf16.mxu0 %v5000_v9  ;;  %v5012_v19 = vpack.c.bf16 %v6061_v47, %v6056_v45  ;;  %v6286_v23 = vsub.f32 %v1801_v10, %v1846_v46  ;;  %v6288_v26 = vsub.f32 %v1802_v11, %v1849_v48 }
 0x140   :  { %5101 = vmatprep.subr.bf16.mxu1 %v5876_v24 }
 0x142   :  { %5003 = vmatpush3.bf16.msra.mxu0 %v5000_v9 }
 0x143   :  { %5103 = vmatpush3.bf16.msra.mxu1 %v5876_v24  ;;  %5005 = vmatprep.subr.bf16.mxu0 %v5004_v2  ;;  %v1787_v24 = vld [vmem:[%s6894_s6] sm:$0xff] }
 0x144   :  { %5105 = vmatprep.subr.bf16.mxu1 %v5899_v29  ;;  %v1804_v5 = vand.u32 4294901760, %v1787_v24 }
 0x146   :  { %5007 = vmatpush3.bf16.msra.mxu0 %v5004_v2  ;;  %v6205_v45 = vsub.f32 %v1787_v24, %v1804_v5  ;;  %v1963_v2 = vand.u32 4294901760, %v6244_v20 }
 0x147   :  { %5107 = vmatpush3.bf16.msra.mxu1 %v5899_v29  ;;  %5009 = vmatprep.subr.bf16.mxu0 %v5008_v15  ;;  %v1788_v29 = vld [vmem:[%s6894_s6 + $0x8] sm:$0xff] }
 0x148   :  { %5109 = vmatprep.subr.bf16.mxu1 %v5911_v32  ;;  %v1807_v34 = vand.u32 4294901760, %v1788_v29  ;;  %v1907_v49 = vand.u32 4294901760, %v6205_v45  ;;  %v1964_v24 = vsub.f32 %v6244_v20, %v1963_v2 }
 0x14a   :  { %5011 = vmatpush3.bf16.msra.mxu0 %v5008_v15  ;;  %v6207_v47 = vsub.f32 %v1788_v29, %v1807_v34  ;;  %v1908_v28 = vsub.f32 %v6205_v45, %v1907_v49  ;;  %v6904_v15 = vand.u32 4294901760, %v6246_v61  ;;  %v6255_v29 = vsub.f32 %v1797_v1, %v1834_v6 }
 0x14b   :  { %5111 = vmatpush3.bf16.msra.mxu1 %v5911_v32  ;;  %5013 = vmatprep.subr.bf16.mxu0 %v5012_v19  ;;  %v6120_v32 = vld [vmem:[%s6894_s6 + $0x10] sm:$0xff] }
 0x14c   :  { %5113 = vmatprep.subr.bf16.mxu1 %v5929_v37  ;;  %v1810_v39 = vand.u32 4294901760, %v6120_v32  ;;  %v1914_v27 = vand.u32 4294901760, %v6207_v47  ;;  %v1909_v52 = vand.u32 4294901760, %v1908_v28  ;;  %v6900_v28 = vand.u32 4294901760, %v6272_v63 }
 0x14d   :  { %v6304_v48 = vpack.c.bf16 %v6207_v47, %v6205_v45 }
 0x14e   :  { %5015 = vmatpush3.bf16.msra.mxu0 %v5012_v19  ;;  %v1915_v31 = vsub.f32 %v6207_v47, %v1914_v27  ;;  %v1999_v25 = vsub.f32 %v6272_v63, %v6900_v28 }
 0x14f   :  { %5115 = vmatpush3.bf16.msra.mxu1 %v5929_v37  ;;  %5017 = vmatprep.subr.bf16.mxu0 %v5969_v36  ;;  %v6130_v37 = vpack.c.bf16 %v1807_v34, %v1804_v5  ;;  %v6257_v5 = vsub.f32 %v1798_v4, %v1837_v33  ;;  %v1971_v34 = vsub.f32 %v6246_v61, %v6904_v15  ;;  %v6901_v33 = vand.u32 4294901760, %v6270_v62 }
 0x150   :  { %5117 = vmatprep.subr.bf16.mxu1 %v5941_v42  ;;  %v1916_v51 = vand.u32 4294901760, %v1915_v31 }
 0x152   :  { %5019 = vmatpush3.bf16.msra.mxu0 %v5969_v36  ;;  %v1816_v36 = vand.u32 4294901760, %v6137_v7  ;;  %v6229_v53 = vpack.c.bf16 %v1916_v51, %v1909_v52  ;;  %v1992_v52 = vsub.f32 %v6270_v62, %v6901_v33  ;;  %v2000_v51 = vand.u32 4294901760, %v1999_v25 }
 0x153   :  { %5119 = vmatpush3.bf16.msra.mxu1 %v5941_v42  ;;  %5021 = vmatprep.subr.bf16.mxu0 %v5971_v38  ;;  %v6151_v42 = vpack.c.bf16 %v1813_v40, %v1810_v39 }
 0x154   :  { %v1993_v43 = vand.u32 4294901760, %v1992_v52 }
 0x156   :  { %4428 = vmatmul.mubr.f32.vlgmr.msra.gmra.mrb[2].mxu1 %v6002_v50  ;;  %5023 = vmatpush3.bf16.msra.mxu0 %v5971_v38  ;;  %v6162_v38 = vpack.c.bf16 %v1819_v16, %v1816_v36  ;;  %v1793_v50 = vld [vmem:[%s6894_s6 + $0x30] sm:$0xff] }
 0x157   :  { %5121 = vmatprep.subr.bf16.mxu0 %v6130_v37  ;;  %v1822_v17 = vand.u32 4294901760, %v1793_v50 }
 0x159   :  { %4323 = vmatmul.mubr.f32.vlgmr.msra.gmra.mrb[2].mxu0 %v6020_v54  ;;  %v1825_v54 = vand.u32 4294901760, %v1794_v13  ;;  %v6232_v12 = vsub.f32 %v1793_v50, %v1822_v17  ;;  %v1965_v50 = vand.u32 4294901760, %v1964_v24 }
 0x15a   :  { %5123 = vmatpush3.bf16.msra.mxu0 %v6130_v37 }
 0x15b   :  { %5125 = vmatprep.subr.bf16.mxu0 %v6151_v42  ;;  %v6173_v55 = vpack.c.bf16 %v1825_v54, %v1822_v17  ;;  %v6234_v56 = vsub.f32 %v1794_v13, %v1825_v54  ;;  %v1949_v57 = vand.u32 4294901760, %v6232_v12  ;;  %v6903_v13 = vand.u32 4294901760, %v6255_v29 }
 0x15c   :  { %v6902_v17 = vand.u32 4294901760, %v6257_v5  ;;  %v1972_v54 = vand.u32 4294901760, %v1971_v34 }
 0x15d   :  { %v1956_v58 = vand.u32 4294901760, %v6234_v56  ;;  %v1950_v59 = vsub.f32 %v6232_v12, %v1949_v57  ;;  %v1978_v14 = vsub.f32 %v6255_v29, %v6903_v13  ;;  %v6308_v34 = vpack.c.bf16 %v6234_v56, %v6232_v12 }
 0x15e   :  { %5127 = vmatpush3.bf16.msra.mxu0 %v6151_v42  ;;  %v1985_v21 = vsub.f32 %v6257_v5, %v6902_v17  ;;  %v6274_v1 = vpack.c.bf16 %v1972_v54, %v1965_v50  ;;  %v6312_v50 = vpack.c.bf16 %v6246_v61, %v6244_v20  ;;  %v6316_v54 = vpack.c.bf16 %v6257_v5, %v6255_v29 }
 0x15f   :  { %5129 = vmatprep.subr.bf16.mxu0 %v6162_v38  ;;  %v1957_v18 = vsub.f32 %v6234_v56, %v1956_v58  ;;  %v1951_v60 = vand.u32 4294901760, %v1950_v59  ;;  %v1979_v4 = vand.u32 4294901760, %v1978_v14  ;;  %v6899_v59 = vand.u32 4294901760, %v6286_v23 }
 0x160   :  { %v1986_v6 = vand.u32 4294901760, %v1985_v21  ;;  %v6320_v14 = vpack.c.bf16 %v6272_v63, %v6270_v62  ;;  %v6324_v21 = vpack.c.bf16 %v6288_v26, %v6286_v23  ;;  %v5260_v47 = vpack.c.bf16 %v1956_v58, %v1949_v57 }
 0x161   :  { %v1958_v9 = vand.u32 4294901760, %v1957_v18  ;;  %v6898_v18 = vand.u32 4294901760, %v6288_v26  ;;  %v6912_v12 = vand.u32 4294901760, %v6270_v62  ;;  %v6913_v56 = vand.u32 4294901760, %v6272_v63 }
 0x162   :  { %5131 = vmatpush3.bf16.msra.mxu0 %v6162_v38  ;;  %v6278_v31 = vpack.c.bf16 %v1986_v6, %v1979_v4  ;;  %v6914_v58 = vand.u32 4294901760, %v6286_v23  ;;  %v6915_v20 = vand.u32 4294901760, %v6288_v26 }
 0x163   :  { %5133 = vmatprep.subr.bf16.mxu0 %v6173_v55  ;;  %v6250_v19 = vpack.c.bf16 %v1958_v9, %v1951_v60  ;;  %v6292_v60 = vpack.c.bf16 %v2000_v51, %v1993_v43  ;;  %v2006_v9 = vsub.f32 %v6286_v23, %v6899_v59  ;;  %v2013_v24 = vsub.f32 %v6288_v26, %v6898_v18 }
 0x164   :  { %v6330_v51 = vsub.f32 %v6120_v32, %v1810_v39  ;;  %v6343_v32 = vsub.f32 %v6137_v7, %v1816_v36  ;;  %v5272_v57 = vpack.c.bf16 %v6913_v56, %v6912_v12  ;;  %v6548_v12 = vld [vmem:[%s6896_s8 + $0x40] sm:$0xff]  ;;  %v6553_v56 = vld [vmem:[%s6896_s8 + $0x48] sm:$0xff] }
 0x165   :  { %v2007_v10 = vand.u32 4294901760, %v2006_v9  ;;  %v2014_v46 = vand.u32 4294901760, %v2013_v24  ;;  %v6335_v9 = vsub.f32 %v6125_v35, %v1813_v40  ;;  %v6348_v35 = vsub.f32 %v6142_v8, %v1819_v16 }
 0x166   :  { %5135 = vmatpush3.bf16.msra.mxu0 %v6173_v55  ;;  %v1921_v59 = vand.u32 4294901760, %v6330_v51  ;;  %v1935_v8 = vand.u32 4294901760, %v6343_v32 }
 0x167   :  { %5137 = vmatprep.subr.bf16.mxu0 %v6183_v0  ;;  %v6300_v11 = vpack.c.bf16 %v2014_v46, %v2007_v10  ;;  %v1942_v36 = vand.u32 4294901760, %v6348_v35 }
 0x169   :  { %v5256_v45 = vpack.c.bf16 %v1942_v36, %v1935_v8 }
 0x16a   :  { %5139 = vmatpush3.bf16.msra.mxu0 %v6183_v0 }
 0x16b   :  { %5141 = vmatprep.subr.bf16.mxu0 %v6193_v22 }
 0x16e   :  { %5143 = vmatpush3.bf16.msra.mxu0 %v6193_v22 }
 0x16f   :  { %5145 = vmatprep.subr.bf16.mxu0 %v6203_v44 }
 0x172   :  { %5147 = vmatpush3.bf16.msra.mxu0 %v6203_v44 }
 0x173   :  { %5149 = vmatprep.subr.bf16.mxu0 %v6219_v30 }
 0x176   :  { %5151 = vmatpush3.bf16.msra.mxu0 %v6219_v30 }
 0x177   :  { %5153 = vmatprep.subr.bf16.mxu0 %v6229_v53 }
 0x229   :  { %v4429_v4 = vpop.f32.mrb[2].mxu1 }
 0x22a   :  { %v1771_v6 = vpop.f32.mrb[3].mxu1 }
 0x22c   :  { %v4324_v52 = vpop.f32.mrb[2].mxu0 }
 0x22d   :  { %v5504_v25 = vadd.f32 %v4324_v52, %v6043_v3  ;;  %v1455_v43 = vpop.f32.mrb[3].mxu0  ;;  %v1928_v3 = vand.u32 4294901760, %v6335_v9 }
 0x22e   :  { %v5506_v24 = vadd.f32 %v1455_v43, %v6045_v41 }
 0x22f   :  { %v5505_v10 = vadd.f32 %v5504_v25, %v4429_v4  ;;  %v1929_v7 = vsub.f32 %v6335_v9, %v1928_v3 }
 0x230   :  { %v5507_v46 = vadd.f32 %v5506_v24, %v1771_v6  ;;  %v1922_v6 = vsub.f32 %v6330_v51, %v1921_v59 }
 0x231   :  { %vm1782_vm3 = vcmp.ge.f32.partialorder %v5505_v10, 0.0  ;;  %v1784_v18 = vmul.f32 0.2, %v5505_v10 }
 0x232   :  { %vm1781_vm4 = vcmp.ge.f32.partialorder %v5507_v46, 0.0  ;;  %v1783_v52 = vmul.f32 0.2, %v5507_v46  ;;  %v1923_v24 = vand.u32 4294901760, %v1922_v6 }
 0x233   :  { %v1786_v41 = vsel %vm1782_vm3, %v5505_v10, %v1784_v18 }
 0x234   :  { %v6350_v39 = vand.u32 4294901760, %v1786_v41  ;;  %v1785_v40 = vsel %vm1781_vm4, %v5507_v46, %v1783_v52  ;;  %v1930_v46 = vand.u32 4294901760, %v1929_v7  ;;  %v1936_v52 = vsub.f32 %v6343_v32, %v1935_v8 }
 0x235   :  { %v6352_v4 = vand.u32 4294901760, %v1785_v40 }
 0x236   :  { %v6358_v25 = vsub.f32 %v1786_v41, %v6350_v39  ;;  %v1943_v41 = vsub.f32 %v6348_v35, %v1942_v36  ;;  %v5156_v17 = vpack.c.bf16 %v1930_v46, %v1923_v24  ;;  %v1937_v13 = vand.u32 4294901760, %v1936_v52  ;;  %v3011_v24 = vld [vmem:[%s6896_s8 + $0x8] sm:$0xff] }
 0x237   :  { %v1885_v16 = vsub.f32 %v1785_v40, %v6352_v4  ;;  %v3030_v46 = vand.u32 4294901760, %v3011_v24 }
 0x238   :  { %v1896_v18 = vand.u32 4294901760, %v6358_v25  ;;  %v1944_v15 = vand.u32 4294901760, %v1943_v41  ;;  %v6497_v41 = vld [vmem:[%s6896_s8 + $0x10] sm:$0xff] }
 0x239   :  { %v1886_v43 = vand.u32 4294901760, %v1885_v16 }
 0x23a   :  { %v1897_v10 = vsub.f32 %v6358_v25, %v1896_v18  ;;  %v5160_v6 = vpack.c.bf16 %v1944_v15, %v1937_v13  ;;  %v5192_v15 = vpack.c.bf16 %v6348_v35, %v6343_v32  ;;  %v5252_v13 = vpack.c.bf16 %v1928_v3, %v1921_v59 }
 0x23b   :  { %v1887_v28 = vsub.f32 %v1885_v16, %v1886_v43 }
 0x23c   :  { %v1898_v40 = vand.u32 4294901760, %v1897_v10 }
 0x23d   :  { %v1888_v33 = vand.u32 4294901760, %v1887_v28 }
 0x23f   :  { %4462 = vmatprep.mubr.f32.mxu0 %v1888_v33 }
 0x240   :  { %4463 = vmatmul.mubr.f32.vlgmr.msra.gmra.mrb[4].mxu0 %v1898_v40  ;;  %v6502_v40 = vld [vmem:[%s6896_s8 + $0x18] sm:$0xff] }
 0x241   :  { %5155 = vmatpush3.bf16.msra.mxu0 %v6229_v53  ;;  %4497 = vmatprep.mubr.f32.mxu0 %v6352_v4  ;;  %v5188_v53 = vpack.c.bf16 %v6335_v9, %v6330_v51 }
 0x242   :  { %5157 = vmatprep.subr.bf16.mxu0 %v5156_v17 }
 0x245   :  { %5159 = vmatpush3.bf16.msra.mxu0 %v5156_v17  ;;  %v6910_v17 = vand.u32 4294901760, %v6255_v29 }
 0x246   :  { %5161 = vmatprep.subr.bf16.mxu0 %v5160_v6 }
 0x249   :  { %5163 = vmatpush3.bf16.msra.mxu0 %v5160_v6  ;;  %v3033_v6 = vand.u32 4294901760, %v6497_v41 }
 0x24a   :  { %5165 = vmatprep.subr.bf16.mxu0 %v6250_v19 }
 0x24d   :  { %5167 = vmatpush3.bf16.msra.mxu0 %v6250_v19  ;;  %v5248_v19 = vpack.c.bf16 %v1914_v27, %v1907_v49  ;;  %v6909_v49 = vand.u32 4294901760, %v6246_v61  ;;  %v5276_v61 = vpack.c.bf16 %v6915_v20, %v6914_v58  ;;  %v3051_v58 = vand.u32 4294901760, %v6548_v12 }
 0x24e   :  { %5169 = vmatprep.subr.bf16.mxu0 %v6274_v1  ;;  %v3054_v20 = vand.u32 4294901760, %v6553_v56 }
 0x24f   :  { %v5264_v27 = vpack.c.bf16 %v6909_v49, %v1963_v2  ;;  %v6528_v49 = vld [vmem:[%s6896_s8 + $0x30] sm:$0xff] }
 0x251   :  { %5171 = vmatpush3.bf16.msra.mxu0 %v6274_v1  ;;  %v6911_v1 = vand.u32 4294901760, %v6257_v5 }
 0x252   :  { %5173 = vmatprep.subr.bf16.mxu0 %v6278_v31 }
 0x253   :  { %v5268_v33 = vpack.c.bf16 %v6911_v1, %v6910_v17  ;;  %v3045_v1 = vand.u32 4294901760, %v6528_v49 }
 0x255   :  { %5175 = vmatpush3.bf16.msra.mxu0 %v6278_v31  ;;  %v2509_v31 = vld [vmem:[%s6895_s7] sm:$0xf] }
 0x256   :  { %5177 = vmatprep.subr.bf16.mxu0 %v6292_v60  ;;  %v2517_v23 = vsel %vm604_vm1, %v2509_v31, 0 }
 0x257   :  { %v2520_v26 = vand.u32 4294901760, %v2517_v23 }
 0x259   :  { %5179 = vmatpush3.bf16.msra.mxu0 %v6292_v60  ;;  %4640 = vmatprep.subr.mxu1 %v2520_v26  ;;  %v2607_v59 = vsub.f32 %v2517_v23, %v2520_v26 }
 0x25a   :  { %5181 = vmatprep.subr.bf16.mxu0 %v6300_v11  ;;  %4641 = vmatpush3.msra.mxu1 %v2520_v26 }
 0x25b   :  { %v2608_v60 = vand.u32 4294901760, %v2607_v59 }
 0x25d   :  { %5183 = vmatpush3.bf16.msra.mxu0 %v6300_v11  ;;  %v2609_v11 = vsub.f32 %v2607_v59, %v2608_v60 }
 0x25e   :  { %5185 = vmatprep.subr.bf16.mxu0 %v6304_v48 }
 0x260   :  { %4498 = vmatmul.mubr.f32.vlgmr.msra.gmra.mrb[4].mxu0 %v6350_v39 }
 0x261   :  { %5187 = vmatpush3.bf16.msra.mxu0 %v6304_v48  ;;  %4532 = vmatprep.mubr.f32.mxu0 %v1885_v16  ;;  %v2610_v48 = vand.u32 4294901760, %v2609_v11 }
 0x262   :  { %5189 = vmatprep.subr.bf16.mxu0 %v5188_v53 }
 0x263   :  { %4645 = vmatprep.subr.mxu1 %v2610_v48 }
 0x265   :  { %5191 = vmatpush3.bf16.msra.mxu0 %v5188_v53  ;;  %v3036_v53 = vand.u32 4294901760, %v6502_v40 }
 0x266   :  { %5193 = vmatprep.subr.bf16.mxu0 %v5192_v15 }
 0x269   :  { %5195 = vmatpush3.bf16.msra.mxu0 %v5192_v15  ;;  %v6510_v15 = vld [vmem:[%s6896_s8 + $0x20] sm:$0xff] }
 0x26a   :  { %5197 = vmatprep.subr.bf16.mxu0 %v6308_v34 }
 0x26d   :  { %5199 = vmatpush3.bf16.msra.mxu0 %v6308_v34 }
 0x26e   :  { %5201 = vmatprep.subr.bf16.mxu0 %v6312_v50 }
 0x271   :  { %5203 = vmatpush3.bf16.msra.mxu0 %v6312_v50 }
 0x272   :  { %5205 = vmatprep.subr.bf16.mxu0 %v6316_v54 }
 0x275   :  { %5207 = vmatpush3.bf16.msra.mxu0 %v6316_v54 }
 0x276   :  { %5209 = vmatprep.subr.bf16.mxu0 %v6320_v14 }
 0x279   :  { %5211 = vmatpush3.bf16.msra.mxu0 %v6320_v14 }
 0x27a   :  { %5213 = vmatprep.subr.bf16.mxu0 %v6324_v21 }
 0x27d   :  { %5215 = vmatpush3.bf16.msra.mxu0 %v6324_v21 }
 0x27e   :  { %5217 = vmatprep.subr.bf16.mxu0 %v6130_v37 }
 0x280   :  { %4533 = vmatmul.mubr.f32.vlgmr.msra.gmra.mrb[4].mxu0 %v6358_v25 }
 0x281   :  { %5219 = vmatpush3.bf16.msra.mxu0 %v6130_v37  ;;  %4567 = vmatprep.mubr.f32.mxu0 %v1886_v43  ;;  %v3010_v43 = vld [vmem:[%s6896_s8] sm:$0xff] }
 0x282   :  { %5221 = vmatprep.subr.bf16.mxu0 %v6151_v42  ;;  %v3027_v10 = vand.u32 4294901760, %v3010_v43 }
 0x284   :  { %v6492_v52 = vpack.c.bf16 %v3030_v46, %v3027_v10 }
 0x285   :  { %5223 = vmatpush3.bf16.msra.mxu0 %v6151_v42 }
 0x286   :  { %5225 = vmatprep.subr.bf16.mxu0 %v6162_v38 }
 0x289   :  { %5227 = vmatpush3.bf16.msra.mxu0 %v6162_v38 }
 0x28a   :  { %5229 = vmatprep.subr.bf16.mxu0 %v6173_v55 }
 0x28d   :  { %5231 = vmatpush3.bf16.msra.mxu0 %v6173_v55 }
 0x28e   :  { %5233 = vmatprep.subr.bf16.mxu0 %v6183_v0 }
 0x291   :  { %5235 = vmatpush3.bf16.msra.mxu0 %v6183_v0 }
 0x292   :  { %5237 = vmatprep.subr.bf16.mxu0 %v6193_v22 }
 0x295   :  { %5239 = vmatpush3.bf16.msra.mxu0 %v6193_v22 }
 0x296   :  { %5241 = vmatprep.subr.bf16.mxu0 %v6203_v44 }
 0x299   :  { %5243 = vmatpush3.bf16.msra.mxu0 %v6203_v44 }
 0x29a   :  { %5245 = vmatprep.subr.bf16.mxu0 %v6219_v30 }
 0x29d   :  { %5247 = vmatpush3.bf16.msra.mxu0 %v6219_v30 }
 0x29e   :  { %5249 = vmatprep.subr.bf16.mxu0 %v5248_v19 }
 0x2a0   :  { %4568 = vmatmul.mubr.f32.vlgmr.msra.gmra.mrb[4].mxu0 %v1896_v18 }
 0x2a1   :  { %5251 = vmatpush3.bf16.msra.mxu0 %v5248_v19  ;;  %4602 = vmatprep.mubr.f32.mxu0 %v6352_v4  ;;  %v6515_v19 = vld [vmem:[%s6896_s8 + $0x28] sm:$0xff] }
 0x2a2   :  { %5253 = vmatprep.subr.bf16.mxu0 %v5252_v13 }
 0x2a5   :  { %5255 = vmatpush3.bf16.msra.mxu0 %v5252_v13  ;;  %v6521_v13 = vpack.c.bf16 %v3036_v53, %v3033_v6 }
 0x2a6   :  { %5257 = vmatprep.subr.bf16.mxu0 %v5256_v45 }
 0x2a9   :  { %5259 = vmatpush3.bf16.msra.mxu0 %v5256_v45  ;;  %v3039_v45 = vand.u32 4294901760, %v6510_v15 }
 0x2aa   :  { %5261 = vmatprep.subr.bf16.mxu0 %v5260_v47 }
 0x2ad   :  { %5263 = vmatpush3.bf16.msra.mxu0 %v5260_v47  ;;  %v3042_v47 = vand.u32 4294901760, %v6515_v19 }
 0x2ae   :  { %5265 = vmatprep.subr.bf16.mxu0 %v5264_v27 }
 0x2af   :  { %v6541_v17 = vpack.c.bf16 %v3042_v47, %v3039_v45 }
 0x2b1   :  { %5267 = vmatpush3.bf16.msra.mxu0 %v5264_v27  ;;  %v6533_v27 = vld [vmem:[%s6896_s8 + $0x38] sm:$0xff] }
 0x2b2   :  { %5269 = vmatprep.subr.bf16.mxu0 %v5268_v33 }
 0x2b5   :  { %5271 = vmatpush3.bf16.msra.mxu0 %v5268_v33  ;;  %v3048_v33 = vand.u32 4294901760, %v6533_v27 }
 0x2b6   :  { %5273 = vmatprep.subr.bf16.mxu0 %v5272_v57 }
 0x2b9   :  { %5275 = vmatpush3.bf16.msra.mxu0 %v5272_v57  ;;  %v6561_v57 = vpack.c.bf16 %v3048_v33, %v3045_v1 }
 0x2ba   :  { %5277 = vmatprep.subr.bf16.mxu0 %v5276_v61 }
 0x2bd   :  { %5279 = vmatpush3.bf16.msra.mxu0 %v5276_v61  ;;  %v6571_v61 = vpack.c.bf16 %v3054_v20, %v3051_v58 }
 0x2be   :  { %5281 = vmatprep.subr.bf16.mxu0 %v6130_v37 }
 0x2c0   :  { %4603 = vmatmul.mubr.f32.vlgmr.msra.gmra.mrb[4].mxu0 %v6350_v39 }
 0x2c1   :  { %5283 = vmatpush3.bf16.msra.mxu0 %v6130_v37  ;;  %4637 = vmatprep.mubr.f32.mxu0 %v6352_v4 }
 0x2c2   :  { %5285 = vmatprep.subr.bf16.mxu0 %v6151_v42 }
 0x2c5   :  { %5287 = vmatpush3.bf16.msra.mxu0 %v6151_v42 }
 0x2c6   :  { %5289 = vmatprep.subr.bf16.mxu0 %v6162_v38 }
 0x2c9   :  { %5291 = vmatpush3.bf16.msra.mxu0 %v6162_v38 }
 0x2ca   :  { %5293 = vmatprep.subr.bf16.mxu0 %v6173_v55 }
 0x2cd   :  { %5295 = vmatpush3.bf16.msra.mxu0 %v6173_v55 }
 0x2ce   :  { %5297 = vmatprep.subr.bf16.mxu0 %v6183_v0 }
 0x2d1   :  { %5299 = vmatpush3.bf16.msra.mxu0 %v6183_v0 }
 0x2d2   :  { %5301 = vmatprep.subr.bf16.mxu0 %v6193_v22 }
 0x2d5   :  { %5303 = vmatpush3.bf16.msra.mxu0 %v6193_v22 }
 0x2d6   :  { %5305 = vmatprep.subr.bf16.mxu0 %v6203_v44 }
 0x2d9   :  { %5307 = vmatpush3.bf16.msra.mxu0 %v6203_v44 }
 0x2da   :  { %5309 = vmatprep.subr.bf16.mxu0 %v6219_v30 }
 0x2dd   :  { %5311 = vmatpush3.bf16.msra.mxu0 %v6219_v30 }
 0x2e0   :  { %4638 = vmatmul.mubr.f32.vlgmr.msra.gmra.mrb[4].mxu0 %v6350_v39 }
 0x3b3   :  { %v4639_v37 = vpop.f32.mrb[4].mxu0 }
 0x3b4   :  { %v2477_v42 = vpop.f32.mrb[5].mxu0  ;;  %v2490_v55 = vsel %vm597_vm2, %v4639_v37, -inf }
 0x3b5   :  { %v2487_v38 = vsel %vm597_vm2, %v2477_v42, -inf }
 0x3b6   :  { %2488 = vmax.xlane.f32.xlu0 %v2487_v38 }
 0x3ba   :  { %2491 = vmax.xlane.f32.xlu0 %v2490_v55 }
 0x443   :  { %v2489_v0 = vpop.xlane.xlu0 %2488 }
 0x444   :  { %v2493_v22 = vsub.f32 %v2477_v42, %v2489_v0  ;;  %v3021_v42 = vld [vmem:[%s6896_s8 + $0x58] sm:$0xff] }
 0x445   :  { %v3060_v55 = vand.u32 4294901760, %v3021_v42 }
 0x446   :  { %v2495_v2 = vmul.f32 1.442695, %v2493_v22  ;;  %v3022_v22 = vld [vmem:[%s6896_s8 + $0x60] sm:$0xff] }
 0x447   :  { %v2492_v29 = vpop.xlane.xlu0 %2491 }
 0x448   :  { %5569 = vpow2.f32 %v2495_v2  ;;  %v2494_v44 = vsub.f32 %v4639_v37, %v2492_v29  ;;  %v3020_v37 = vld [vmem:[%s6896_s8 + $0x50] sm:$0xff]  ;;  %v3023_v2 = vld [vmem:[%s6896_s8 + $0x68] sm:$0xff]  ;;  %v3063_v29 = vand.u32 4294901760, %v3022_v22 }
 0x449   :  { %v3057_v38 = vand.u32 4294901760, %v3020_v37 }
 0x44a   :  { %v2497_v5 = vmul.f32 1.442695, %v2494_v44  ;;  %v3066_v44 = vand.u32 4294901760, %v3023_v2 }
 0x44b   :  { %v6582_v0 = vpack.c.bf16 %v3060_v55, %v3057_v38 }
 0x44c   :  { %5571 = vpow2.f32 %v2497_v5  ;;  %v6592_v5 = vpack.c.bf16 %v3066_v44, %v3063_v29 }
 0x452   :  { %v5570_v62 = vpop.eup %5569 }
 0x453   :  { %v2499_v30 = vsel %vm597_vm2, %v5570_v62, 0.0 }
 0x454   :  { %2500 = vadd.xlane.f32.xlu1 %v2499_v30  ;;  %v6596_v30 = vsub.f32 %v3011_v24, %v3030_v46 }
 0x456   :  { %v5572_v63 = vpop.eup %5571 }
 0x457   :  { %v2502_v28 = vsel %vm597_vm2, %v5572_v63, 0.0 }
 0x458   :  { %2503 = vadd.xlane.f32.xlu1 %v2502_v28  ;;  %v3025_v28 = vld [vmem:[%s6896_s8 + $0x78] sm:$0xff] }
 0x459   :  { %v3072_v23 = vand.u32 4294901760, %v3025_v28 }
 0x4e1   :  { %v2501_v34 = vpop.xlane.xlu1 %2500 }
 0x4e2   :  { %5573 = vrcp.f32 %v2501_v34 }
 0x4e5   :  { %v2504_v50 = vpop.xlane.xlu1 %2503 }
 0x4e6   :  { %5575 = vrcp.f32 %v2504_v50 }
 0x4ec   :  { %v5574_v54 = vpop.eup %5573 }
 0x4ed   :  { %v2506_v14 = vmul.f32 %v5574_v54, %v5570_v62  ;;  %v6594_v62 = vsub.f32 %v3010_v43, %v3027_v10  ;;  %v6646_v43 = vsub.f32 %v3025_v28, %v3072_v23 }
 0x4ef   :  { %v2511_v21 = vsel %vm597_vm2, %v2506_v14, 0  ;;  %v6621_v14 = vsub.f32 %v3020_v37, %v3057_v38  ;;  %v6905_v37 = vand.u32 4294901760, %v6646_v43 }
 0x4f0   :  { %v5576_v51 = vpop.eup %5575  ;;  %v2585_v9 = vand.u32 4294901760, %v2511_v21 }
 0x4f1   :  { %v2508_v3 = vmul.f32 %v5576_v51, %v5572_v63  ;;  %v3024_v63 = vld [vmem:[%s6896_s8 + $0x70] sm:$0xff]  ;;  %v3200_v51 = vand.u32 4294901760, %v6621_v14 }
 0x4f2   :  { %v2586_v32 = vsub.f32 %v2511_v21, %v2585_v9  ;;  %v3069_v31 = vand.u32 4294901760, %v3024_v63  ;;  %v6623_v21 = vsub.f32 %v3021_v42, %v3060_v55  ;;  %v3236_v55 = vsub.f32 %v6646_v43, %v6905_v37 }
 0x4f3   :  { %v2514_v35 = vsel %vm597_vm2, %v2508_v3, 0  ;;  %v3201_v3 = vsub.f32 %v6621_v14, %v3200_v51 }
 0x4f4   :  { %v2595_v39 = vand.u32 4294901760, %v2514_v35  ;;  %v2587_v4 = vand.u32 4294901760, %v2586_v32  ;;  %v6669_v28 = vpack.c.bf16 %v6623_v21, %v6621_v14 }
 0x4f6   :  { %v2588_v25 = vsub.f32 %v2586_v32, %v2587_v4  ;;  %v2596_v7 = vsub.f32 %v2514_v35, %v2595_v39  ;;  %v6633_v35 = vsub.f32 %v3022_v22, %v3063_v29  ;;  %v3237_v29 = vand.u32 4294901760, %v3236_v55 }
 0x4f8   :  { %v2589_v8 = vand.u32 4294901760, %v2588_v25  ;;  %v2597_v36 = vand.u32 4294901760, %v2596_v7 }
 0x4fa   :  { %4642 = vmatprep.mubr.f32.mxu1 %v2589_v8  ;;  %v2598_v16 = vsub.f32 %v2596_v7, %v2597_v36 }
 0x4fc   :  { %v2599_v18 = vand.u32 4294901760, %v2598_v16 }
 0x4fe   :  { %4643 = vmatmul.mubr.f32.vlgmr.msra.gmra.mrb[4].mxu1 %v2599_v18  ;;  %v6644_v18 = vsub.f32 %v3024_v63, %v3069_v31  ;;  %v6665_v63 = vpack.c.bf16 %v6596_v30, %v6594_v62 }
 0x4ff   :  { %4646 = vmatpush3.msra.mxu1 %v2610_v48  ;;  %4647 = vmatprep.mubr.f32.mxu1 %v2585_v9 }
 0x500   :  { %4650 = vmatprep.subr.mxu1 %v2607_v59  ;;  %v6906_v46 = vand.u32 4294901760, %v6644_v18 }
 0x502   :  { %v3229_v38 = vsub.f32 %v6644_v18, %v6906_v46 }
 0x506   :  { %4648 = vmatmul.mubr.f32.vlgmr.msra.gmra.mrb[4].mxu1 %v2595_v39 }
 0x507   :  { %4651 = vmatpush3.msra.mxu1 %v2607_v59  ;;  %4652 = vmatprep.mubr.f32.mxu1 %v2586_v32  ;;  %v3137_v59 = vand.u32 4294901760, %v6596_v30 }
 0x508   :  { %4655 = vmatprep.subr.mxu1 %v2520_v26 }
 0x509   :  { %v3138_v48 = vsub.f32 %v6596_v30, %v3137_v59 }
 0x50b   :  { %v3139_v50 = vand.u32 4294901760, %v3138_v48  ;;  %v6687_v48 = vsub.f32 %v6502_v40, %v3036_v53  ;;  %v5577_v40 = vld [vmem:[%s6889_s1 + $0x8] sm:$0xff] }
 0x50e   :  { %4653 = vmatmul.mubr.f32.vlgmr.msra.gmra.mrb[4].mxu1 %v2596_v7  ;;  %v6908_v7 = vand.u32 4294901760, %v6633_v35 }
 0x50f   :  { %4656 = vmatpush3.msra.mxu1 %v2520_v26  ;;  %4657 = vmatprep.mubr.f32.mxu1 %v2587_v4  ;;  %v3202_v4 = vand.u32 4294901760, %v3201_v3 }
 0x510   :  { %4660 = vmatprep.subr.mxu1 %v2608_v60  ;;  %v3215_v16 = vsub.f32 %v6633_v35, %v6908_v7 }
 0x512   :  { %v3216_v10 = vand.u32 4294901760, %v3215_v16 }
 0x516   :  { %4658 = vmatmul.mubr.f32.vlgmr.msra.gmra.mrb[4].mxu1 %v2597_v36 }
 0x517   :  { %4661 = vmatpush3.msra.mxu1 %v2608_v60  ;;  %4662 = vmatprep.mubr.f32.mxu1 %v2585_v9  ;;  %v6608_v60 = vpack.c.bf16 %v3072_v23, %v3069_v31  ;;  %v6677_v23 = vpack.c.bf16 %v6646_v43, %v6644_v18 }
 0x518   :  { %4665 = vmatprep.subr.mxu1 %v2520_v26 }
 0x51e   :  { %4663 = vmatmul.mubr.f32.vlgmr.msra.gmra.mrb[4].mxu1 %v2595_v39 }
 0x51f   :  { %4666 = vmatpush3.msra.mxu1 %v2520_v26  ;;  %4667 = vmatprep.mubr.f32.mxu1 %v2585_v9  ;;  %v3130_v26 = vand.u32 4294901760, %v6594_v62  ;;  %v3207_v9 = vand.u32 4294901760, %v6623_v21 }
 0x520   :  { %5313 = vmatprep.subr.bf16.mxu1 %v6492_v52 }
 0x521   :  { %v3131_v11 = vsub.f32 %v6594_v62, %v3130_v26  ;;  %v3208_v32 = vsub.f32 %v6623_v21, %v3207_v9 }
 0x523   :  { %v3132_v34 = vand.u32 4294901760, %v3131_v11  ;;  %v3209_v25 = vand.u32 4294901760, %v3208_v32  ;;  %v6682_v11 = vsub.f32 %v6497_v41, %v3033_v6  ;;  %v6694_v32 = vsub.f32 %v6510_v15, %v3039_v45 }
 0x524   :  { %v6699_v41 = vsub.f32 %v6515_v19, %v3042_v47 }
 0x525   :  { %v6618_v54 = vpack.c.bf16 %v3139_v50, %v3132_v34  ;;  %v6639_v36 = vpack.c.bf16 %v3209_v25, %v3202_v4  ;;  %v3144_v34 = vand.u32 4294901760, %v6682_v11  ;;  %v3151_v50 = vand.u32 4294901760, %v6687_v48  ;;  %v5578_v4 = vld [vmem:[%s6889_s1] sm:$0xff]  ;;  %s5603_s1 = smov [#allocation2]  }
 0x526   :  { %4668 = vmatmul.mubr.f32.vlgmr.msra.gmra.mrb[4].mxu1 %v2595_v39  ;;  %v6635_v39 = vsub.f32 %v3023_v2, %v3066_v44  ;;  %v3230_v2 = vand.u32 4294901760, %v3229_v38  ;;  %v3158_v47 = vand.u32 4294901760, %v6694_v32  ;;  %v6730_v38 = vsub.f32 %v6533_v27, %v3048_v33  ;;  %s3717_s22 = sshll.u32 %s5603_s1, 4  ;;  %s3718_s22 = int_to_ptr.vmem [resolvable:$true] %s3717_s22 }
 0x527   :  { %5315 = vmatpush3.bf16.msra.mxu1 %v6492_v52  ;;  %v3145_v15 = vsub.f32 %v6682_v11, %v3144_v34  ;;  %v3152_v19 = vsub.f32 %v6687_v48, %v3151_v50  ;;  %s5579_s23 = scalar_lea.vmem %s3718_s22, 256  ;;  %p5584_p1 = scmp.lt.s32.totalorder %s3718_s22, %s3718_s22 }
 0x528   :  { %5317 = vmatprep.subr.bf16.mxu1 %v6521_v13  ;;  %v6907_v8 = vand.u32 4294901760, %v6635_v39  ;;  %v6661_v44 = vpack.c.bf16 %v3237_v29, %v3230_v2  ;;  %v6673_v31 = vpack.c.bf16 %v6635_v39, %v6633_v35  ;;  %p5580_p0 = scmp.ne.s32.totalorder %s3718_s22, %s5579_s23  ;;  %p5585_p2 = scmp.lt.s32.totalorder %s5579_s23, %s5579_s23 }
 0x529   :  { %v3146_v29 = vand.u32 4294901760, %v3145_v15 }
 0x52a   :  { %v3222_v24 = vsub.f32 %v6635_v39, %v6907_v8  ;;  %p5586_p3 = por %p5585_p2, %p5584_p1 }
 0x52b   :  { %5319 = vmatpush3.bf16.msra.mxu1 %v6521_v13 }
 0x52c   :  { %5321 = vmatprep.subr.bf16.mxu1 %v6541_v17  ;;  %v3223_v42 = vand.u32 4294901760, %v3222_v24  ;;  %v3165_v24 = vand.u32 4294901760, %v6699_v41  ;;  %p5587_p4 = pnand %p5586_p3, %p5580_p0 }
 0x52e   :  { %v6659_v22 = vpack.c.bf16 %v3223_v42, %v3216_v10  ;;  %v6722_v10 = vsub.f32 %v6528_v49, %v3045_v1  ;;  %v3159_v49 = vsub.f32 %v6694_v32, %v3158_v47  ;;  %v3166_v1 = vsub.f32 %v6699_v41, %v3165_v24 }
 0x52f   :  { %5323 = vmatpush3.bf16.msra.mxu1 %v6541_v17  ;;  %v5448_v62 = vpack.c.bf16 %v3165_v24, %v3158_v47 }
 0x530   :  { %5325 = vmatprep.subr.bf16.mxu1 %v6561_v57  ;;  %v3172_v27 = vand.u32 4294901760, %v6722_v10  ;;  %v3160_v37 = vand.u32 4294901760, %v3159_v49  ;;  %v3167_v46 = vand.u32 4294901760, %v3166_v1 }
 0x532   :  { %v3173_v8 = vsub.f32 %v6722_v10, %v3172_v27 }
 0x533   :  { %5327 = vmatpush3.bf16.msra.mxu1 %v6561_v57 }
 0x534   :  { %5329 = vmatprep.subr.bf16.mxu1 %v6571_v61 }
 0x537   :  { %5331 = vmatpush3.bf16.msra.mxu1 %v6571_v61 }
 0x538   :  { %5333 = vmatprep.subr.bf16.mxu1 %v6582_v0 }
 0x53b   :  { %5335 = vmatpush3.bf16.msra.mxu1 %v6582_v0 }
 0x53c   :  { %5337 = vmatprep.subr.bf16.mxu1 %v6592_v5 }
 0x53f   :  { %5339 = vmatpush3.bf16.msra.mxu1 %v6592_v5 }
 0x540   :  { %5341 = vmatprep.subr.bf16.mxu1 %v6608_v60 }
 0x543   :  { %5343 = vmatpush3.bf16.msra.mxu1 %v6608_v60 }
 0x544   :  { %5345 = vmatprep.subr.bf16.mxu1 %v6618_v54 }
 0x5f9   :  { %v4669_v3 = vpop.f32.mrb[4].mxu1 }
 0x5fa   :  { %v3009_v6 = vmul.f32 %v5577_v40, %v4669_v3  ;;  %v2998_v53 = vpop.f32.mrb[5].mxu1  ;;  %v3153_v3 = vand.u32 4294901760, %v3152_v19 }
 0x5fb   :  { %v3008_v25 = vmul.f32 %v5578_v4, %v2998_v53  ;;  %v6751_v53 = vsub.f32 %v6548_v12, %v3051_v58  ;;  %v6756_v4 = vsub.f32 %v6553_v56, %v3054_v20  ;;  %v5352_v20 = vpack.c.bf16 %v3167_v46, %v3160_v37 }
 0x5fc   :  { %v6707_v16 = vand.u32 4294901760, %v3009_v6  ;;  %v5348_v15 = vpack.c.bf16 %v3153_v3, %v3146_v29  ;;  %v3174_v29 = vand.u32 4294901760, %v3173_v8  ;;  %v5380_v8 = vpack.c.bf16 %v6687_v48, %v6682_v11 }
 0x5fd   :  { %v6715_v45 = vand.u32 4294901760, %v3008_v25  ;;  %v3186_v56 = vand.u32 4294901760, %v6751_v53  ;;  %v3193_v58 = vand.u32 4294901760, %v6756_v4  ;;  %v5388_v46 = vpack.c.bf16 %v6730_v38, %v6722_v10 }
 0x5fe   :  { %v6725_v42 = vsub.f32 %v3009_v6, %v6707_v16  ;;  %v3179_v6 = vand.u32 4294901760, %v6730_v38  ;;  %v5392_v37 = vpack.c.bf16 %v6756_v4, %v6751_v53  ;;  %v6919_v11 = vand.u32 4294901760, %v6646_v43 }
 0x5ff   :  { %v6733_v55 = vsub.f32 %v3008_v25, %v6715_v45  ;;  %v3187_v49 = vsub.f32 %v6751_v53, %v3186_v56  ;;  %v3194_v1 = vsub.f32 %v6756_v4, %v3193_v58 }
 0x600   :  { %v3119_v2 = vand.u32 4294901760, %v6725_v42  ;;  %v3180_v12 = vsub.f32 %v6730_v38, %v3179_v6  ;;  %v5452_v30 = vpack.c.bf16 %v3179_v6, %v3172_v27 }
 0x601   :  { %v3109_v40 = vand.u32 4294901760, %v6733_v55 }
 0x602   :  { %v3120_v33 = vsub.f32 %v6725_v42, %v3119_v2  ;;  %v3181_v3 = vand.u32 4294901760, %v3180_v12 }
 0x603   :  { %v3110_v25 = vsub.f32 %v6733_v55, %v3109_v40 }
 0x604   :  { %v3121_v7 = vand.u32 4294901760, %v3120_v33  ;;  %v5356_v33 = vpack.c.bf16 %v3181_v3, %v3174_v29 }
 0x605   :  { %v3111_v19 = vand.u32 4294901760, %v3110_v25  ;;  %v3195_v25 = vand.u32 4294901760, %v3194_v1 }
 0x607   :  { %4702 = vmatprep.mubr.f32.mxu1 %v3111_v19 }
 0x608   :  { %4703 = vmatmul.mubr.f32.vlgmr.msra.gmra.mrb[6].mxu1 %v3121_v7  ;;  %v3188_v7 = vand.u32 4294901760, %v3187_v49 }
 0x609   :  { %5347 = vmatpush3.bf16.msra.mxu1 %v6618_v54  ;;  %4737 = vmatprep.mubr.f32.mxu1 %v6715_v45 }
 0x60a   :  { %5349 = vmatprep.subr.bf16.mxu1 %v5348_v15  ;;  %v5360_v54 = vpack.c.bf16 %v3195_v25, %v3188_v7 }
 0x60d   :  { %5351 = vmatpush3.bf16.msra.mxu1 %v5348_v15 }
 0x60e   :  { %5353 = vmatprep.subr.bf16.mxu1 %v5352_v20 }
 0x611   :  { %5355 = vmatpush3.bf16.msra.mxu1 %v5352_v20 }
 0x612   :  { %5357 = vmatprep.subr.bf16.mxu1 %v5356_v33 }
 0x615   :  { %5359 = vmatpush3.bf16.msra.mxu1 %v5356_v33 }
 0x616   :  { %5361 = vmatprep.subr.bf16.mxu1 %v5360_v54 }
 0x619   :  { %5363 = vmatpush3.bf16.msra.mxu1 %v5360_v54 }
 0x61a   :  { %5365 = vmatprep.subr.bf16.mxu1 %v6639_v36 }
 0x61d   :  { %5367 = vmatpush3.bf16.msra.mxu1 %v6639_v36  ;;  %v5384_v36 = vpack.c.bf16 %v6699_v41, %v6694_v32 }
 0x61e   :  { %5369 = vmatprep.subr.bf16.mxu1 %v6659_v22 }
 0x621   :  { %5371 = vmatpush3.bf16.msra.mxu1 %v6659_v22  ;;  %v5440_v22 = vpack.c.bf16 %v3137_v59, %v3130_v26  ;;  %v5456_v26 = vpack.c.bf16 %v3193_v58, %v3186_v56  ;;  %v5460_v59 = vpack.c.bf16 %v3207_v9, %v3200_v51 }
 0x622   :  { %5373 = vmatprep.subr.bf16.mxu1 %v6661_v44 }
 0x625   :  { %5375 = vmatpush3.bf16.msra.mxu1 %v6661_v44  ;;  %v5444_v44 = vpack.c.bf16 %v3151_v50, %v3144_v34 }
 0x626   :  { %5377 = vmatprep.subr.bf16.mxu1 %v6665_v63 }
 0x628   :  { %4738 = vmatmul.mubr.f32.vlgmr.msra.gmra.mrb[6].mxu1 %v6707_v16 }
 0x629   :  { %5379 = vmatpush3.bf16.msra.mxu1 %v6665_v63  ;;  %4772 = vmatprep.mubr.f32.mxu1 %v6733_v55  ;;  %v6916_v63 = vand.u32 4294901760, %v6633_v35 }
 0x62a   :  { %5381 = vmatprep.subr.bf16.mxu1 %v5380_v8 }
 0x62d   :  { %5383 = vmatpush3.bf16.msra.mxu1 %v5380_v8 }
 0x62e   :  { %5385 = vmatprep.subr.bf16.mxu1 %v5384_v36 }
 0x631   :  { %5387 = vmatpush3.bf16.msra.mxu1 %v5384_v36 }
 0x632   :  { %5389 = vmatprep.subr.bf16.mxu1 %v5388_v46 }
 0x635   :  { %5391 = vmatpush3.bf16.msra.mxu1 %v5388_v46 }
 0x636   :  { %5393 = vmatprep.subr.bf16.mxu1 %v5392_v37 }
 0x639   :  { %5395 = vmatpush3.bf16.msra.mxu1 %v5392_v37 }
 0x63a   :  { %5397 = vmatprep.subr.bf16.mxu1 %v6669_v28 }
 0x63d   :  { %5399 = vmatpush3.bf16.msra.mxu1 %v6669_v28  ;;  %v6917_v28 = vand.u32 4294901760, %v6635_v39 }
 0x63e   :  { %5401 = vmatprep.subr.bf16.mxu1 %v6673_v31 }
 0x641   :  { %5403 = vmatpush3.bf16.msra.mxu1 %v6673_v31  ;;  %v5464_v31 = vpack.c.bf16 %v6917_v28, %v6916_v63 }
 0x642   :  { %5405 = vmatprep.subr.bf16.mxu1 %v6677_v23 }
 0x645   :  { %5407 = vmatpush3.bf16.msra.mxu1 %v6677_v23  ;;  %v6918_v23 = vand.u32 4294901760, %v6644_v18 }
 0x646   :  { %5409 = vmatprep.subr.bf16.mxu1 %v6492_v52 }
 0x647   :  { %v5468_v48 = vpack.c.bf16 %v6919_v11, %v6918_v23 }
 0x648   :  { %4773 = vmatmul.mubr.f32.vlgmr.msra.gmra.mrb[6].mxu1 %v6725_v42 }
 0x649   :  { %5411 = vmatpush3.bf16.msra.mxu1 %v6492_v52  ;;  %4807 = vmatprep.mubr.f32.mxu1 %v3109_v40 }
 0x64a   :  { %5413 = vmatprep.subr.bf16.mxu1 %v6521_v13 }
 0x64d   :  { %5415 = vmatpush3.bf16.msra.mxu1 %v6521_v13 }
 0x64e   :  { %5417 = vmatprep.subr.bf16.mxu1 %v6541_v17 }
 0x651   :  { %5419 = vmatpush3.bf16.msra.mxu1 %v6541_v17 }
 0x652   :  { %5421 = vmatprep.subr.bf16.mxu1 %v6561_v57 }
 0x655   :  { %5423 = vmatpush3.bf16.msra.mxu1 %v6561_v57 }
 0x656   :  { %5425 = vmatprep.subr.bf16.mxu1 %v6571_v61 }
 0x659   :  { %5427 = vmatpush3.bf16.msra.mxu1 %v6571_v61 }
 0x65a   :  { %5429 = vmatprep.subr.bf16.mxu1 %v6582_v0 }
 0x65d   :  { %5431 = vmatpush3.bf16.msra.mxu1 %v6582_v0 }
 0x65e   :  { %5433 = vmatprep.subr.bf16.mxu1 %v6592_v5 }
 0x661   :  { %5435 = vmatpush3.bf16.msra.mxu1 %v6592_v5 }
 0x662   :  { %5437 = vmatprep.subr.bf16.mxu1 %v6608_v60 }
 0x665   :  { %5439 = vmatpush3.bf16.msra.mxu1 %v6608_v60 }
 0x666   :  { %5441 = vmatprep.subr.bf16.mxu1 %v5440_v22 }
 0x668   :  { %4808 = vmatmul.mubr.f32.vlgmr.msra.gmra.mrb[6].mxu1 %v3119_v2 }
 0x669   :  { %5443 = vmatpush3.bf16.msra.mxu1 %v5440_v22  ;;  %4842 = vmatprep.mubr.f32.mxu1 %v6715_v45 }
 0x66a   :  { %5445 = vmatprep.subr.bf16.mxu1 %v5444_v44 }
 0x66d   :  { %5447 = vmatpush3.bf16.msra.mxu1 %v5444_v44 }
 0x66e   :  { %5449 = vmatprep.subr.bf16.mxu1 %v5448_v62 }
 0x671   :  { %5451 = vmatpush3.bf16.msra.mxu1 %v5448_v62 }
 0x672   :  { %5453 = vmatprep.subr.bf16.mxu1 %v5452_v30 }
 0x675   :  { %5455 = vmatpush3.bf16.msra.mxu1 %v5452_v30 }
 0x676   :  { %5457 = vmatprep.subr.bf16.mxu1 %v5456_v26 }
 0x679   :  { %5459 = vmatpush3.bf16.msra.mxu1 %v5456_v26 }
 0x67a   :  { %5461 = vmatprep.subr.bf16.mxu1 %v5460_v59 }
 0x67d   :  { %5463 = vmatpush3.bf16.msra.mxu1 %v5460_v59 }
 0x67e   :  { %5465 = vmatprep.subr.bf16.mxu1 %v5464_v31 }
 0x681   :  { %5467 = vmatpush3.bf16.msra.mxu1 %v5464_v31 }
 0x682   :  { %5469 = vmatprep.subr.bf16.mxu1 %v5468_v48 }
 0x685   :  { %5471 = vmatpush3.bf16.msra.mxu1 %v5468_v48 }
 0x686   :  { %5473 = vmatprep.subr.bf16.mxu1 %v6492_v52 }
 0x688   :  { %4843 = vmatmul.mubr.f32.vlgmr.msra.gmra.mrb[6].mxu1 %v6707_v16 }
 0x689   :  { %5475 = vmatpush3.bf16.msra.mxu1 %v6492_v52  ;;  %4877 = vmatprep.mubr.f32.mxu1 %v6715_v45 }
 0x68a   :  { %5477 = vmatprep.subr.bf16.mxu1 %v6521_v13 }
 0x68d   :  { %5479 = vmatpush3.bf16.msra.mxu1 %v6521_v13 }
 0x68e   :  { %5481 = vmatprep.subr.bf16.mxu1 %v6541_v17 }
 0x691   :  { %5483 = vmatpush3.bf16.msra.mxu1 %v6541_v17 }
 0x692   :  { %5485 = vmatprep.subr.bf16.mxu1 %v6561_v57 }
 0x695   :  { %5487 = vmatpush3.bf16.msra.mxu1 %v6561_v57 }
 0x696   :  { %5489 = vmatprep.subr.bf16.mxu1 %v6571_v61 }
 0x699   :  { %5491 = vmatpush3.bf16.msra.mxu1 %v6571_v61 }
 0x69a   :  { %5493 = vmatprep.subr.bf16.mxu1 %v6582_v0 }
 0x69d   :  { %5495 = vmatpush3.bf16.msra.mxu1 %v6582_v0 }
 0x69e   :  { %5497 = vmatprep.subr.bf16.mxu1 %v6592_v5 }
 0x6a1   :  { %5499 = vmatpush3.bf16.msra.mxu1 %v6592_v5 }
 0x6a2   :  { %5501 = vmatprep.subr.bf16.mxu1 %v6608_v60 }
 0x6a5   :  { %5503 = vmatpush3.bf16.msra.mxu1 %v6608_v60 }
 0x6a8   :  { %4878 = vmatmul.mubr.f32.vlgmr.msra.gmra.mrb[6].mxu1 %v6707_v16 }
 0x77b   :  { %v4879_v52 = vpop.f32.mrb[6].mxu1 }
 0x77c   :  { %3711 = vst.msk [vmem:[#allocation2 + $0x8] sm:$0xff] %vm43_vm0, %v4879_v52  ;;  %v3700_v13 = vpop.f32.mrb[7].mxu1 }
 0x77d   :  { %3710 = vst.msk [vmem:[#allocation2] sm:$0xff] %vm43_vm0, %v3700_v13 }
 0x77e   :  { %5590 = shalt.err (!%p5587_p4)
}
 0x77f   :  { %s5591_s25 = scalar_lea.hbm %s6897_s9, 256 }
 0x780   :  { %p5592_p5 = scmp.ne.s32.totalorder %s6897_s9, %s5591_s25  ;;  %p5595_p6 = scmp.lt.u32.totalorder %s5591_s25, %s6897_s9 }
 0x782   :  { %p5597_p7 = pnand %p5595_p6, %p5592_p5 }
 0x784   :  { %5600 = shalt.err (!%p5597_p7)
}
 0x785   :  { %s5604_s4 = smov 128   ;;  %s5605_s30 = smov 8  }
 0x786   :  { %3723 = dma.vmem_to_hbm [thread:$0]  %s3718_s22, 256, %s6897_s9, [#allocation3], %s5604_s4, %s5604_s4, %s5605_s30  }
 0x787   :  { %5601 = dma.done.wait [#allocation3], 256  }
 0x788   :  { %5602 = vsyncadd [#allocation3], 4294967040 }
 0x789   :  { %3727 = vsyncpa [#allocation3], 1 }

</bundles_post_ra>
